<compile_context>
chip_gen: v6e
topology: v6e:2x2x1
jax: 0.10.0
libtpu: 0.0.40
codegen_flags: <defaults>
</compile_context>

<pallas_src>
import jax
import jax.numpy as jnp
from jax.experimental import pallas as pl
from jax.experimental.pallas import tpu as pltpu

EPS = 1e-5
NEG_SLOPE = 0.1
_VMEM_LIMIT = 32 * 1024 * 1024    # safe scoped-VMEM ceiling on v5e/v6e/v7x
_VMEM_BUDGET = 12 * 1024 * 1024   # target double-buffered per-step working set


def _leaky(x):
    return jnp.where(x >= 0, x, NEG_SLOPE * x)


# =============================================================================
# Pixel-major path (small Cin/Cout, HW % 128 == 0): blocks (1, C, TP, 128)
# =============================================================================

def _xstats_px_kernel(x_ref, sum_ref, sq_ref):
    """Per-channel, per-n partial sum / sum-of-squares of x (lane-wise partials)."""
    @pl.when(pl.program_id(1) == 0)
    def _():
        sum_ref[...] = jnp.zeros_like(sum_ref)
        sq_ref[...] = jnp.zeros_like(sq_ref)

    cin = x_ref.shape[1]
    x = x_ref[0]                                              # (Cin, TP, 128)
    s_rows, q_rows = [], []
    for c in range(cin):
        xc = x[c]                                             # (TP, 128)
        s_rows.append(jnp.sum(xc, axis=0, keepdims=True))     # (1, 128)
        q_rows.append(jnp.sum(xc * xc, axis=0, keepdims=True))
    sum_ref[0] += jnp.concatenate(s_rows, axis=0)             # (Cin, 128)
    sq_ref[0] += jnp.concatenate(q_rows, axis=0)


def _ystats_px_kernel(x_ref, p1_ref, w_ref, sum_ref, sq_ref):
    """Partial sum / sum-of-squares of y = pointwise(leaky(a1*x + c1))."""
    @pl.when(pl.program_id(1) == 0)
    def _():
        sum_ref[...] = jnp.zeros_like(sum_ref)
        sq_ref[...] = jnp.zeros_like(sq_ref)

    cin = x_ref.shape[1]
    cout = w_ref.shape[0]
    x = x_ref[0]                                              # (Cin, TP, 128)
    hs = [_leaky(p1_ref[0, c] * x[c] + p1_ref[1, c]) for c in range(cin)]
    s_rows, q_rows = [], []
    for o in range(cout):
        y = hs[0] * w_ref[o, 0]
        for c in range(1, cin):
            y = y + hs[c] * w_ref[o, c]
        s_rows.append(jnp.sum(y, axis=0, keepdims=True))
        q_rows.append(jnp.sum(y * y, axis=0, keepdims=True))
    sum_ref[0] += jnp.concatenate(s_rows, axis=0)             # (Cout, 128)
    sq_ref[0] += jnp.concatenate(q_rows, axis=0)


def _apply_px_kernel(x_ref, p1_ref, w_ref, p2_ref, o_ref):
    """out = leaky(a2 * pointwise(leaky(a1*x + c1)) + c2)."""
    cin = x_ref.shape[1]
    cout = o_ref.shape[1]
    x = x_ref[0]
    hs = [_leaky(p1_ref[0, c] * x[c] + p1_ref[1, c]) for c in range(cin)]
    for o in range(cout):
        y = hs[0] * w_ref[o, 0]
        for c in range(1, cin):
            y = y + hs[c] * w_ref[o, c]
        o_ref[0, o] = _leaky(p2_ref[0, o] * y + p2_ref[1, o]).astype(o_ref.dtype)


def _pick_row_tile(p, cin, cout):
    """Tile (in 128-pixel rows) sized from a VMEM budget; multiple of 8 dividing p."""
    per_row = (cin + cout) * 128 * 4 * 2          # double-buffered in+out bytes / row
    cap = min(128, max(8, _VMEM_BUDGET // per_row))   # <= 16384 pixels per tile
    best = None
    tp = 8
    while tp <= min(p, cap):
        if p % tp == 0:
            best = tp
        tp += 8
    return best if best is not None else p        # full extent also allowed


def _forward_pixel_major(x_nchw, wdw, g1, b1, wpw, g2, b2):
    N, Cin, H, W = x_nchw.shape
    Cout = wpw.shape[0]
    HW = H * W
    P = HW // 128
    M = N * HW

    x = x_nchw.reshape(N, Cin, P, 128)            # metadata-only reshape (contiguous)
    TP = _pick_row_tile(P, Cin, Cout)
    grid = (N, P // TP)

    x_spec = pl.BlockSpec((1, Cin, TP, 128), lambda n, t: (n, 0, t, 0))
    smem = pl.BlockSpec(memory_space=pltpu.MemorySpace.SMEM)
    stat_spec = lambda c: pl.BlockSpec((1, c, 128), lambda n, t: (n, 0, 0))

    params_stats = pltpu.CompilerParams(
        dimension_semantics=("parallel", "arbitrary"),   # per-n partials -> megacore OK
        vmem_limit_bytes=_VMEM_LIMIT)
    params_apply = pltpu.CompilerParams(
        dimension_semantics=("parallel", "parallel"),
        vmem_limit_bytes=_VMEM_LIMIT)

    # -------- pass 1: per-channel stats of x --------
    xsum_p, xsq_p = pl.pallas_call(
        _xstats_px_kernel,
        out_shape=(jax.ShapeDtypeStruct((N, Cin, 128), jnp.float32),) * 2,
        grid=grid,
        in_specs=[x_spec],
        out_specs=(stat_spec(Cin), stat_spec(Cin)),
        compiler_params=params_stats,
    )(x)

    inv_m = 1.0 / float(M)
    mean_x = jnp.sum(xsum_p, axis=(0, 2)) * inv_m                      # (Cin,)
    # NOTE: E[x^2]-E[x]^2 in f32; Welford-style combine would be safer at scale.
    var_x = jnp.maximum(jnp.sum(xsq_p, axis=(0, 2)) * inv_m - mean_x * mean_x, 0.0)

    # depthwise(1x1) + BN1 folded exactly into per-channel affine a1*x + c1:
    #   h = w*x, mean_h = w*mean_x, var_h = w^2*var_x
    inv_std1 = jax.lax.rsqrt(wdw * wdw * var_x + EPS)
    a1 = wdw * g1 * inv_std1
    c1 = b1 - a1 * mean_x
    p1 = jnp.stack([a1, c1], axis=0)                                   # (2, Cin) -> SMEM

    # -------- pass 2: per-channel stats of y --------
    ysum_p, ysq_p = pl.pallas_call(
        _ystats_px_kernel,
        out_shape=(jax.ShapeDtypeStruct((N, Cout, 128), jnp.float32),) * 2,
        grid=grid,
        in_specs=[x_spec, smem, smem],
        out_specs=(stat_spec(Cout), stat_spec(Cout)),
        compiler_params=params_stats,
    )(x, p1, wpw)

    mean_y = jnp.sum(ysum_p, axis=(0, 2)) * inv_m
    var_y = jnp.maximum(jnp.sum(ysq_p, axis=(0, 2)) * inv_m - mean_y * mean_y, 0.0)
    a2 = g2 * jax.lax.rsqrt(var_y + EPS)
    c2 = b2 - a2 * mean_y
    p2 = jnp.stack([a2, c2], axis=0)                                   # (2, Cout) -> SMEM

    # -------- pass 3: apply + write output --------
    out = pl.pallas_call(
        _apply_px_kernel,
        out_shape=jax.ShapeDtypeStruct((N, Cout, P, 128), jnp.float32),
        grid=grid,
        in_specs=[x_spec, smem, smem, smem],
        out_specs=pl.BlockSpec((1, Cout, TP, 128), lambda n, t: (n, 0, t, 0)),
        compiler_params=params_apply,
    )(x, p1, wpw, p2)

    return out.reshape(N, Cout, H, W)


# =============================================================================
# Channel-major fallback path (large channels or HW % 128 != 0): blocks (1, C, T)
# =============================================================================

def _pointwise(w, h):
    """(Cout, Cin) @ (Cin, T) -> (Cout, T).  VPU FMAs for small Cin, MXU otherwise."""
    cout, cin = w.shape
    if cin <= 32:  # small contraction: MXU padding to 128/256 wastes the array
        y = w[:, 0:1] * h[0:1, :]
        for c in range(1, cin):
            y = y + w[:, c:c + 1] * h[c:c + 1, :]
        return y.astype(jnp.float32)
    return jnp.dot(w, h, preferred_element_type=jnp.float32)


def _xstats_cm_kernel(x_ref, sum_ref, sq_ref):
    @pl.when(pl.program_id(1) == 0)
    def _():
        sum_ref[...] = jnp.zeros_like(sum_ref)
        sq_ref[...] = jnp.zeros_like(sq_ref)
    xb = x_ref[0]                                              # (Cin, T)
    sum_ref[0] += jnp.sum(xb, axis=1, keepdims=True)           # (Cin, 1)
    sq_ref[0] += jnp.sum(xb * xb, axis=1, keepdims=True)


def _ystats_cm_kernel(x_ref, a1_ref, c1_ref, w_ref, sum_ref, sq_ref):
    @pl.when(pl.program_id(1) == 0)
    def _():
        sum_ref[...] = jnp.zeros_like(sum_ref)
        sq_ref[...] = jnp.zeros_like(sq_ref)
    h = _leaky(a1_ref[...] * x_ref[0] + c1_ref[...])           # (Cin, T)
    y = _pointwise(w_ref[...], h)                              # (Cout, T)
    sum_ref[0] += jnp.sum(y, axis=1, keepdims=True)
    sq_ref[0] += jnp.sum(y * y, axis=1, keepdims=True)


def _apply_cm_kernel(x_ref, a1_ref, c1_ref, w_ref, a2_ref, c2_ref, o_ref):
    h = _leaky(a1_ref[...] * x_ref[0] + c1_ref[...])
    y = _pointwise(w_ref[...], h)
    o_ref[0] = _leaky(a2_ref[...] * y + c2_ref[...]).astype(o_ref.dtype)


def _pick_hw_tile(hw, cin, cout):
    """Largest 128-multiple divisor of hw within a VMEM budget; else full extent."""
    if hw % 128 != 0:
        # TODO(synk): cdiv grid + masked tail for non-128-multiple H*W; a single
        # full-extent tile keeps correctness for this (rare) case.
        return hw
    pad8 = lambda c: ((c + 7) // 8) * 8
    per_px = (pad8(cin) + pad8(cout)) * 4 * 2
    cap = min(16384, max(128, (_VMEM_BUDGET // per_px) // 128 * 128))
    best, t = 128, 128
    while t <= min(hw, cap):
        if hw % t == 0:
            best = t
        t += 128
    return best


def _forward_channel_major(x_nchw, wdw, g1, b1, wpw, g2, b2):
    N, Cin, H, W = x_nchw.shape
    Cout = wpw.shape[0]
    HW = H * W
    M = N * HW

    x = x_nchw.reshape(N, Cin, HW)                 # reshape only -- no HBM transpose
    T = _pick_hw_tile(HW, Cin, Cout)
    grid = (N, HW // T)

    x_spec = pl.BlockSpec((1, Cin, T), lambda n, t: (n, 0, t))
    vec_spec = lambda c: pl.BlockSpec((c, 1), lambda n, t: (0, 0))
    mat_spec = pl.BlockSpec((Cout, Cin), lambda n, t: (0, 0))
    stat_spec = lambda c: pl.BlockSpec((1, c, 1), lambda n, t: (n, 0, 0))

    params_stats = pltpu.CompilerParams(
        dimension_semantics=("parallel", "arbitrary"), vmem_limit_bytes=_VMEM_LIMIT)
    params_apply = pltpu.CompilerParams(
        dimension_semantics=("parallel", "parallel"), vmem_limit_bytes=_VMEM_LIMIT)

    xsum_p, xsq_p = pl.pallas_call(
        _xstats_cm_kernel,
        out_shape=(jax.ShapeDtypeStruct((N, Cin, 1), jnp.float32),) * 2,
        grid=grid, in_specs=[x_spec],
        out_specs=(stat_spec(Cin), stat_spec(Cin)),
        compiler_params=params_stats,
    )(x)

    inv_m = 1.0 / float(M)
    mean_x = jnp.sum(xsum_p, axis=0) * inv_m                           # (Cin, 1)
    var_x = jnp.maximum(jnp.sum(xsq_p, axis=0) * inv_m - mean_x * mean_x, 0.0)

    wdw_c = wdw.reshape(Cin, 1)
    inv_std1 = jax.lax.rsqrt(wdw_c * wdw_c * var_x + EPS)
    a1 = wdw_c * g1.reshape(Cin, 1) * inv_std1
    c1 = b1.reshape(Cin, 1) - a1 * mean_x

    ysum_p, ysq_p = pl.pallas_call(
        _ystats_cm_kernel,
        out_shape=(jax.ShapeDtypeStruct((N, Cout, 1), jnp.float32),) * 2,
        grid=grid,
        in_specs=[x_spec, vec_spec(Cin), vec_spec(Cin), mat_spec],
        out_specs=(stat_spec(Cout), stat_spec(Cout)),
        compiler_params=params_stats,
    )(x, a1, c1, wpw)

    mean_y = jnp.sum(ysum_p, axis=0) * inv_m
    var_y = jnp.maximum(jnp.sum(ysq_p, axis=0) * inv_m - mean_y * mean_y, 0.0)
    a2 = g2.reshape(Cout, 1) * jax.lax.rsqrt(var_y + EPS)
    c2 = b2.reshape(Cout, 1) - a2 * mean_y

    out = pl.pallas_call(
        _apply_cm_kernel,
        out_shape=jax.ShapeDtypeStruct((N, Cout, HW), jnp.float32),
        grid=grid,
        in_specs=[x_spec, vec_spec(Cin), vec_spec(Cin), mat_spec,
                  vec_spec(Cout), vec_spec(Cout)],
        out_specs=pl.BlockSpec((1, Cout, T), lambda n, t: (n, 0, t)),
        compiler_params=params_apply,
    )(x, a1, c1, wpw, a2, c2)

    return out.reshape(N, Cout, H, W)


# =============================================================================
# Dispatcher + pure-JAX reference
# =============================================================================

def depthwise_separable_conv(x_nchw, w_dw, g1, b1, w_pw, g2, b2):
    """x_nchw: (N, Cin, H, W) float32.  Returns (N, Cout, H, W) float32."""
    N, Cin, H, W = x_nchw.shape
    Cout = w_pw.shape[0]
    HW = H * W
    wdw = w_dw.reshape(Cin)                 # depthwise 1x1 weight -> per-channel scale
    wpw = w_pw.reshape(Cout, Cin)           # pointwise 1x1 weight

    if Cin <= 32 and Cout <= 32 and HW % 128 == 0:
        return _forward_pixel_major(x_nchw, wdw, g1, b1, wpw, g2, b2)
    return _forward_channel_major(x_nchw, wdw, g1, b1, wpw, g2, b2)


def _reference(x_nchw, w_dw, g1, b1, w_pw, g2, b2):
    """Pure-JAX reference mirroring the PyTorch forward (training-mode BN)."""
    N, Cin, H, W = x_nchw.shape
    Cout = w_pw.shape[0]
    h = x_nchw * w_dw.reshape(1, Cin, 1, 1)
    m = jnp.mean(h, axis=(0, 2, 3), keepdims=True)
    v = jnp.mean((h - m) ** 2, axis=(0, 2, 3), keepdims=True)
    h = (h - m) * jax.lax.rsqrt(v + EPS) * g1.reshape(1, Cin, 1, 1) + b1.reshape(1, Cin, 1, 1)
    h = _leaky(h)
    y = jnp.einsum("nchw,oc->nohw", h, w_pw.reshape(Cout, Cin))
    m2 = jnp.mean(y, axis=(0, 2, 3), keepdims=True)
    v2 = jnp.mean((y - m2) ** 2, axis=(0, 2, 3), keepdims=True)
    y = (y - m2) * jax.lax.rsqrt(v2 + EPS) * g2.reshape(1, Cout, 1, 1) + b2.reshape(1, Cout, 1, 1)
    return _leaky(y)


if __name__ == "__main__":
    N, Cin, Cout, H, W = 2, 4, 8, 16, 16

    key = jax.random.PRNGKey(0)
    kx, k_dw, k_pw, kg1, kb1, kg2, kb2 = jax.random.split(key, 7)

    x = jax.random.normal(kx, (N, Cin, H, W), dtype=jnp.float32)

    # Parameter shapes match nn.Conv2d / nn.BatchNorm2d.
    w_dw = jax.random.normal(k_dw, (Cin, 1, 1, 1), dtype=jnp.float32) * 0.5
    w_pw = jax.random.normal(k_pw, (Cout, Cin, 1, 1), dtype=jnp.float32) * 0.5
    g1 = 1.0 + 0.1 * jax.random.normal(kg1, (Cin,), dtype=jnp.float32)
    b1 = 0.1 * jax.random.normal(kb1, (Cin,), dtype=jnp.float32)
    g2 = 1.0 + 0.1 * jax.random.normal(kg2, (Cout,), dtype=jnp.float32)
    b2 = 0.1 * jax.random.normal(kb2, (Cout,), dtype=jnp.float32)

    fn = jax.jit(depthwise_separable_conv)
    out = jax.block_until_ready(fn(x, w_dw, g1, b1, w_pw, g2, b2))

    ref = _reference(x, w_dw, g1, b1, w_pw, g2, b2)
    assert out.shape == (N, Cout, H, W)
    assert jnp.allclose(out, ref, atol=1e-4, rtol=1e-4), "mismatch vs reference"

    print("KERNEL_OK")
</pallas_src>

<mosaic_0001>
module attributes {stable_mosaic.version = 11 : i64} {
  func.func @_xstats_px_kernel(%arg0: i32, %arg1: i32, %arg2: memref<1x4x2x128xf32, #tpu.memory_space<vmem>>, %arg3: memref<1x4x128xf32, #tpu.memory_space<vmem>>, %arg4: memref<1x4x128xf32, #tpu.memory_space<vmem>>) attributes {dimension_semantics = [#tpu.dimension_semantics<parallel>, #tpu.dimension_semantics<arbitrary>], iteration_bounds = array<i64: 2, 1>, scalar_prefetch = 0 : i64, scratch_operands = 0 : i64, tpu.core_type = #tpu.core_type<tc>, window_params = [{transform_indices = @transform_0, window_bounds = array<i64: 1, 4, 2, 128>}, {transform_indices = @transform_1, window_bounds = array<i64: 1, 4, 128>}, {transform_indices = @transform_2, window_bounds = array<i64: 1, 4, 128>}]} {
    %c0_i32 = arith.constant 0 : i32
    %0 = arith.cmpi eq, %arg1, %c0_i32 : i32
    %1 = arith.extui %0 : i1 to i32
    %c0_i32_0 = arith.constant 0 : i32
    %2 = arith.cmpi ne, %1, %c0_i32_0 : i32
    scf.if %2 {
      %cst_23 = arith.constant 0.000000e+00 : f32
      %47 = vector.broadcast %cst_23 : f32 to vector<1x4x128xf32>
      %c0_24 = arith.constant 0 : index
      %c0_25 = arith.constant 0 : index
      %c0_26 = arith.constant 0 : index
      %48 = vector.load %arg3[%c0_24, %c0_25, %c0_26] : memref<1x4x128xf32, #tpu.memory_space<vmem>>, vector<1x4x128xf32>
      tpu.vector_store %arg3[%c0_24, %c0_25, %c0_26], %47 {strides = array<i32>} : memref<1x4x128xf32, #tpu.memory_space<vmem>>, vector<1x4x128xf32>,
      %cst_27 = arith.constant 0.000000e+00 : f32
      %49 = vector.broadcast %cst_27 : f32 to vector<1x4x128xf32>
      %c0_28 = arith.constant 0 : index
      %c0_29 = arith.constant 0 : index
      %c0_30 = arith.constant 0 : index
      %50 = vector.load %arg4[%c0_28, %c0_29, %c0_30] : memref<1x4x128xf32, #tpu.memory_space<vmem>>, vector<1x4x128xf32>
      tpu.vector_store %arg4[%c0_28, %c0_29, %c0_30], %49 {strides = array<i32>} : memref<1x4x128xf32, #tpu.memory_space<vmem>>, vector<1x4x128xf32>,
    } else {
    }
    %c0 = arith.constant 0 : index
    %c0_1 = arith.constant 0 : index
    %c0_2 = arith.constant 0 : index
    %c0_3 = arith.constant 0 : index
    %3 = vector.load %arg2[%c0, %c0_1, %c0_2, %c0_3] : memref<1x4x2x128xf32, #tpu.memory_space<vmem>>, vector<1x4x2x128xf32>
    %4 = vector.shape_cast %3 : vector<1x4x2x128xf32> to vector<4x2x128xf32>
    %5 = vector.extract_strided_slice %4 {offsets = [0, 0, 0], sizes = [1, 2, 128], strides = [1, 1, 1]} : vector<4x2x128xf32> to vector<1x2x128xf32>
    %6 = vector.shape_cast %5 : vector<1x2x128xf32> to vector<2x128xf32>
    %cst = arith.constant dense<0.000000e+00> : vector<128xf32>
    %7 = vector.multi_reduction <add>, %6, %cst [0] : vector<2x128xf32> to vector<128xf32>
    %8 = vector.shape_cast %7 : vector<128xf32> to vector<1x128xf32>
    %9 = arith.mulf %6, %6 : vector<2x128xf32>
    %cst_4 = arith.constant dense<0.000000e+00> : vector<128xf32>
    %10 = vector.multi_reduction <add>, %9, %cst_4 [0] : vector<2x128xf32> to vector<128xf32>
    %11 = vector.shape_cast %10 : vector<128xf32> to vector<1x128xf32>
    %12 = vector.extract_strided_slice %4 {offsets = [1, 0, 0], sizes = [1, 2, 128], strides = [1, 1, 1]} : vector<4x2x128xf32> to vector<1x2x128xf32>
    %13 = vector.shape_cast %12 : vector<1x2x128xf32> to vector<2x128xf32>
    %cst_5 = arith.constant dense<0.000000e+00> : vector<128xf32>
    %14 = vector.multi_reduction <add>, %13, %cst_5 [0] : vector<2x128xf32> to vector<128xf32>
    %15 = vector.shape_cast %14 : vector<128xf32> to vector<1x128xf32>
    %16 = arith.mulf %13, %13 : vector<2x128xf32>
    %cst_6 = arith.constant dense<0.000000e+00> : vector<128xf32>
    %17 = vector.multi_reduction <add>, %16, %cst_6 [0] : vector<2x128xf32> to vector<128xf32>
    %18 = vector.shape_cast %17 : vector<128xf32> to vector<1x128xf32>
    %19 = vector.extract_strided_slice %4 {offsets = [2, 0, 0], sizes = [1, 2, 128], strides = [1, 1, 1]} : vector<4x2x128xf32> to vector<1x2x128xf32>
    %20 = vector.shape_cast %19 : vector<1x2x128xf32> to vector<2x128xf32>
    %cst_7 = arith.constant dense<0.000000e+00> : vector<128xf32>
    %21 = vector.multi_reduction <add>, %20, %cst_7 [0] : vector<2x128xf32> to vector<128xf32>
    %22 = vector.shape_cast %21 : vector<128xf32> to vector<1x128xf32>
    %23 = arith.mulf %20, %20 : vector<2x128xf32>
    %cst_8 = arith.constant dense<0.000000e+00> : vector<128xf32>
    %24 = vector.multi_reduction <add>, %23, %cst_8 [0] : vector<2x128xf32> to vector<128xf32>
    %25 = vector.shape_cast %24 : vector<128xf32> to vector<1x128xf32>
    %26 = vector.extract_strided_slice %4 {offsets = [3, 0, 0], sizes = [1, 2, 128], strides = [1, 1, 1]} : vector<4x2x128xf32> to vector<1x2x128xf32>
    %27 = vector.shape_cast %26 : vector<1x2x128xf32> to vector<2x128xf32>
    %cst_9 = arith.constant dense<0.000000e+00> : vector<128xf32>
    %28 = vector.multi_reduction <add>, %27, %cst_9 [0] : vector<2x128xf32> to vector<128xf32>
    %29 = vector.shape_cast %28 : vector<128xf32> to vector<1x128xf32>
    %30 = arith.mulf %27, %27 : vector<2x128xf32>
    %cst_10 = arith.constant dense<0.000000e+00> : vector<128xf32>
    %31 = vector.multi_reduction <add>, %30, %cst_10 [0] : vector<2x128xf32> to vector<128xf32>
    %32 = vector.shape_cast %31 : vector<128xf32> to vector<1x128xf32>
    %c0_11 = arith.constant 0 : index
    %c0_12 = arith.constant 0 : index
    %c0_13 = arith.constant 0 : index
    %33 = vector.load %arg3[%c0_11, %c0_12, %c0_13] : memref<1x4x128xf32, #tpu.memory_space<vmem>>, vector<1x4x128xf32>
    %34 = vector.shape_cast %33 : vector<1x4x128xf32> to vector<4x128xf32>
    %35 = tpu.concatenate %8, %15, %22, %29 in 0 : vector<1x128xf32>, vector<1x128xf32>, vector<1x128xf32>, vector<1x128xf32> -> vector<4x128xf32>
    %36 = arith.addf %34, %35 : vector<4x128xf32>
    %c0_14 = arith.constant 0 : index
    %c0_15 = arith.constant 0 : index
    %c0_16 = arith.constant 0 : index
    %37 = vector.load %arg3[%c0_14, %c0_15, %c0_16] : memref<1x4x128xf32, #tpu.memory_space<vmem>>, vector<1x4x128xf32>
    %38 = vector.shape_cast %37 : vector<1x4x128xf32> to vector<4x128xf32>
    %39 = vector.shape_cast %36 : vector<4x128xf32> to vector<1x4x128xf32>
    tpu.vector_store %arg3[%c0_14, %c0_15, %c0_16], %39 {strides = array<i32>} : memref<1x4x128xf32, #tpu.memory_space<vmem>>, vector<1x4x128xf32>,
    %c0_17 = arith.constant 0 : index
    %c0_18 = arith.constant 0 : index
    %c0_19 = arith.constant 0 : index
    %40 = vector.load %arg4[%c0_17, %c0_18, %c0_19] : memref<1x4x128xf32, #tpu.memory_space<vmem>>, vector<1x4x128xf32>
    %41 = vector.shape_cast %40 : vector<1x4x128xf32> to vector<4x128xf32>
    %42 = tpu.concatenate %11, %18, %25, %32 in 0 : vector<1x128xf32>, vector<1x128xf32>, vector<1x128xf32>, vector<1x128xf32> -> vector<4x128xf32>
    %43 = arith.addf %41, %42 : vector<4x128xf32>
    %c0_20 = arith.constant 0 : index
    %c0_21 = arith.constant 0 : index
    %c0_22 = arith.constant 0 : index
    %44 = vector.load %arg4[%c0_20, %c0_21, %c0_22] : memref<1x4x128xf32, #tpu.memory_space<vmem>>, vector<1x4x128xf32>
    %45 = vector.shape_cast %44 : vector<1x4x128xf32> to vector<4x128xf32>
    %46 = vector.shape_cast %43 : vector<4x128xf32> to vector<1x4x128xf32>
    tpu.vector_store %arg4[%c0_20, %c0_21, %c0_22], %46 {strides = array<i32>} : memref<1x4x128xf32, #tpu.memory_space<vmem>>, vector<1x4x128xf32>,
    return
  }
  func.func @transform_0(%arg0: i32, %arg1: i32) -> (i32, i32, i32, i32) {
    %c0_i32 = arith.constant 0 : i32
    %c0_i32_0 = arith.constant 0 : i32
    %c0_i32_1 = arith.constant 0 : i32
    return %arg0, %c0_i32, %arg1, %c0_i32_0 : i32, i32, i32, i32
  }
  func.func @transform_1(%arg0: i32, %arg1: i32) -> (i32, i32, i32) {
    %c0_i32 = arith.constant 0 : i32
    %c0_i32_0 = arith.constant 0 : i32
    %c0_i32_1 = arith.constant 0 : i32
    return %arg0, %c0_i32, %c0_i32_0 : i32, i32, i32
  }
  func.func @transform_2(%arg0: i32, %arg1: i32) -> (i32, i32, i32) {
    %c0_i32 = arith.constant 0 : i32
    %c0_i32_0 = arith.constant 0 : i32
    %c0_i32_1 = arith.constant 0 : i32
    return %arg0, %c0_i32, %c0_i32_0 : i32, i32, i32
  }
}

module attributes {stable_mosaic.version = 11 : i64} {
  func.func @_ystats_px_kernel(%arg0: i32, %arg1: i32, %arg2: memref<1x4x2x128xf32, #tpu.memory_space<vmem>>, %arg3: memref<2x4xf32, #tpu.memory_space<smem>>, %arg4: memref<8x4xf32, #tpu.memory_space<smem>>, %arg5: memref<1x8x128xf32, #tpu.memory_space<vmem>>, %arg6: memref<1x8x128xf32, #tpu.memory_space<vmem>>) attributes {dimension_semantics = [#tpu.dimension_semantics<parallel>, #tpu.dimension_semantics<arbitrary>], iteration_bounds = array<i64: 2, 1>, scalar_prefetch = 0 : i64, scratch_operands = 0 : i64, tpu.core_type = #tpu.core_type<tc>, window_params = [{transform_indices = @transform_0, window_bounds = array<i64: 1, 4, 2, 128>}, {transform_indices = @transform_1, window_bounds = array<i64: 2, 4>}, {transform_indices = @transform_2, window_bounds = array<i64: 8, 4>}, {transform_indices = @transform_3, window_bounds = array<i64: 1, 8, 128>}, {transform_indices = @transform_4, window_bounds = array<i64: 1, 8, 128>}]} {
    %c0_i32 = arith.constant 0 : i32
    %0 = arith.cmpi eq, %arg1, %c0_i32 : i32
    %1 = arith.extui %0 : i1 to i32
    %c0_i32_0 = arith.constant 0 : i32
    %2 = arith.cmpi ne, %1, %c0_i32_0 : i32
    scf.if %2 {
      %cst_112 = arith.constant 0.000000e+00 : f32
      %231 = vector.broadcast %cst_112 : f32 to vector<1x8x128xf32>
      %c0_113 = arith.constant 0 : index
      %c0_114 = arith.constant 0 : index
      %c0_115 = arith.constant 0 : index
      %232 = vector.load %arg5[%c0_113, %c0_114, %c0_115] : memref<1x8x128xf32, #tpu.memory_space<vmem>>, vector<1x8x128xf32>
      tpu.vector_store %arg5[%c0_113, %c0_114, %c0_115], %231 {strides = array<i32>} : memref<1x8x128xf32, #tpu.memory_space<vmem>>, vector<1x8x128xf32>,
      %cst_116 = arith.constant 0.000000e+00 : f32
      %233 = vector.broadcast %cst_116 : f32 to vector<1x8x128xf32>
      %c0_117 = arith.constant 0 : index
      %c0_118 = arith.constant 0 : index
      %c0_119 = arith.constant 0 : index
      %234 = vector.load %arg6[%c0_117, %c0_118, %c0_119] : memref<1x8x128xf32, #tpu.memory_space<vmem>>, vector<1x8x128xf32>
      tpu.vector_store %arg6[%c0_117, %c0_118, %c0_119], %233 {strides = array<i32>} : memref<1x8x128xf32, #tpu.memory_space<vmem>>, vector<1x8x128xf32>,
    } else {
    }
    %c0 = arith.constant 0 : index
    %c0_1 = arith.constant 0 : index
    %c0_2 = arith.constant 0 : index
    %c0_3 = arith.constant 0 : index
    %3 = vector.load %arg2[%c0, %c0_1, %c0_2, %c0_3] : memref<1x4x2x128xf32, #tpu.memory_space<vmem>>, vector<1x4x2x128xf32>
    %4 = vector.shape_cast %3 : vector<1x4x2x128xf32> to vector<4x2x128xf32>
    %c0_4 = arith.constant 0 : index
    %c0_5 = arith.constant 0 : index
    %5 = memref.load %arg3[%c0_4, %c0_5] : memref<2x4xf32, #tpu.memory_space<smem>>
    %6 = vector.extract_strided_slice %4 {offsets = [0, 0, 0], sizes = [1, 2, 128], strides = [1, 1, 1]} : vector<4x2x128xf32> to vector<1x2x128xf32>
    %7 = vector.shape_cast %6 : vector<1x2x128xf32> to vector<2x128xf32>
    %8 = vector.broadcast %5 : f32 to vector<2x128xf32>
    %9 = arith.mulf %8, %7 : vector<2x128xf32>
    %c1 = arith.constant 1 : index
    %c0_6 = arith.constant 0 : index
    %10 = memref.load %arg3[%c1, %c0_6] : memref<2x4xf32, #tpu.memory_space<smem>>
    %11 = vector.broadcast %10 : f32 to vector<2x128xf32>
    %12 = arith.addf %9, %11 : vector<2x128xf32>
    %cst = arith.constant 0.000000e+00 : f32
    %13 = vector.broadcast %cst : f32 to vector<2x128xf32>
    %14 = arith.cmpf oge, %12, %13 : vector<2x128xf32>
    %cst_7 = arith.constant 1.000000e-01 : f32
    %15 = vector.broadcast %cst_7 : f32 to vector<2x128xf32>
    %16 = arith.mulf %15, %12 : vector<2x128xf32>
    %17 = arith.select %14, %12, %16 : vector<2x128xi1>, vector<2x128xf32>
    %c0_8 = arith.constant 0 : index
    %c1_9 = arith.constant 1 : index
    %18 = memref.load %arg3[%c0_8, %c1_9] : memref<2x4xf32, #tpu.memory_space<smem>>
    %19 = vector.extract_strided_slice %4 {offsets = [1, 0, 0], sizes = [1, 2, 128], strides = [1, 1, 1]} : vector<4x2x128xf32> to vector<1x2x128xf32>
    %20 = vector.shape_cast %19 : vector<1x2x128xf32> to vector<2x128xf32>
    %21 = vector.broadcast %18 : f32 to vector<2x128xf32>
    %22 = arith.mulf %21, %20 : vector<2x128xf32>
    %c1_10 = arith.constant 1 : index
    %c1_11 = arith.constant 1 : index
    %23 = memref.load %arg3[%c1_10, %c1_11] : memref<2x4xf32, #tpu.memory_space<smem>>
    %24 = vector.broadcast %23 : f32 to vector<2x128xf32>
    %25 = arith.addf %22, %24 : vector<2x128xf32>
    %cst_12 = arith.constant 0.000000e+00 : f32
    %26 = vector.broadcast %cst_12 : f32 to vector<2x128xf32>
    %27 = arith.cmpf oge, %25, %26 : vector<2x128xf32>
    %cst_13 = arith.constant 1.000000e-01 : f32
    %28 = vector.broadcast %cst_13 : f32 to vector<2x128xf32>
    %29 = arith.mulf %28, %25 : vector<2x128xf32>
    %30 = arith.select %27, %25, %29 : vector<2x128xi1>, vector<2x128xf32>
    %c0_14 = arith.constant 0 : index
    %c2 = arith.constant 2 : index
    %31 = memref.load %arg3[%c0_14, %c2] : memref<2x4xf32, #tpu.memory_space<smem>>
    %32 = vector.extract_strided_slice %4 {offsets = [2, 0, 0], sizes = [1, 2, 128], strides = [1, 1, 1]} : vector<4x2x128xf32> to vector<1x2x128xf32>
    %33 = vector.shape_cast %32 : vector<1x2x128xf32> to vector<2x128xf32>
    %34 = vector.broadcast %31 : f32 to vector<2x128xf32>
    %35 = arith.mulf %34, %33 : vector<2x128xf32>
    %c1_15 = arith.constant 1 : index
    %c2_16 = arith.constant 2 : index
    %36 = memref.load %arg3[%c1_15, %c2_16] : memref<2x4xf32, #tpu.memory_space<smem>>
    %37 = vector.broadcast %36 : f32 to vector<2x128xf32>
    %38 = arith.addf %35, %37 : vector<2x128xf32>
    %cst_17 = arith.constant 0.000000e+00 : f32
    %39 = vector.broadcast %cst_17 : f32 to vector<2x128xf32>
    %40 = arith.cmpf oge, %38, %39 : vector<2x128xf32>
    %cst_18 = arith.constant 1.000000e-01 : f32
    %41 = vector.broadcast %cst_18 : f32 to vector<2x128xf32>
    %42 = arith.mulf %41, %38 : vector<2x128xf32>
    %43 = arith.select %40, %38, %42 : vector<2x128xi1>, vector<2x128xf32>
    %c0_19 = arith.constant 0 : index
    %c3 = arith.constant 3 : index
    %44 = memref.load %arg3[%c0_19, %c3] : memref<2x4xf32, #tpu.memory_space<smem>>
    %45 = vector.extract_strided_slice %4 {offsets = [3, 0, 0], sizes = [1, 2, 128], strides = [1, 1, 1]} : vector<4x2x128xf32> to vector<1x2x128xf32>
    %46 = vector.shape_cast %45 : vector<1x2x128xf32> to vector<2x128xf32>
    %47 = vector.broadcast %44 : f32 to vector<2x128xf32>
    %48 = arith.mulf %47, %46 : vector<2x128xf32>
    %c1_20 = arith.constant 1 : index
    %c3_21 = arith.constant 3 : index
    %49 = memref.load %arg3[%c1_20, %c3_21] : memref<2x4xf32, #tpu.memory_space<smem>>
    %50 = vector.broadcast %49 : f32 to vector<2x128xf32>
    %51 = arith.addf %48, %50 : vector<2x128xf32>
    %cst_22 = arith.constant 0.000000e+00 : f32
    %52 = vector.broadcast %cst_22 : f32 to vector<2x128xf32>
    %53 = arith.cmpf oge, %51, %52 : vector<2x128xf32>
    %cst_23 = arith.constant 1.000000e-01 : f32
    %54 = vector.broadcast %cst_23 : f32 to vector<2x128xf32>
    %55 = arith.mulf %54, %51 : vector<2x128xf32>
    %56 = arith.select %53, %51, %55 : vector<2x128xi1>, vector<2x128xf32>
    %c0_24 = arith.constant 0 : index
    %c0_25 = arith.constant 0 : index
    %57 = memref.load %arg4[%c0_24, %c0_25] : memref<8x4xf32, #tpu.memory_space<smem>>
    %58 = vector.broadcast %57 : f32 to vector<2x128xf32>
    %59 = arith.mulf %17, %58 : vector<2x128xf32>
    %c0_26 = arith.constant 0 : index
    %c1_27 = arith.constant 1 : index
    %60 = memref.load %arg4[%c0_26, %c1_27] : memref<8x4xf32, #tpu.memory_space<smem>>
    %61 = vector.broadcast %60 : f32 to vector<2x128xf32>
    %62 = arith.mulf %30, %61 : vector<2x128xf32>
    %63 = arith.addf %59, %62 : vector<2x128xf32>
    %c0_28 = arith.constant 0 : index
    %c2_29 = arith.constant 2 : index
    %64 = memref.load %arg4[%c0_28, %c2_29] : memref<8x4xf32, #tpu.memory_space<smem>>
    %65 = vector.broadcast %64 : f32 to vector<2x128xf32>
    %66 = arith.mulf %43, %65 : vector<2x128xf32>
    %67 = arith.addf %63, %66 : vector<2x128xf32>
    %c0_30 = arith.constant 0 : index
    %c3_31 = arith.constant 3 : index
    %68 = memref.load %arg4[%c0_30, %c3_31] : memref<8x4xf32, #tpu.memory_space<smem>>
    %69 = vector.broadcast %68 : f32 to vector<2x128xf32>
    %70 = arith.mulf %56, %69 : vector<2x128xf32>
    %71 = arith.addf %67, %70 : vector<2x128xf32>
    %cst_32 = arith.constant dense<0.000000e+00> : vector<128xf32>
    %72 = vector.multi_reduction <add>, %71, %cst_32 [0] : vector<2x128xf32> to vector<128xf32>
    %73 = vector.shape_cast %72 : vector<128xf32> to vector<1x128xf32>
    %74 = arith.mulf %71, %71 : vector<2x128xf32>
    %cst_33 = arith.constant dense<0.000000e+00> : vector<128xf32>
    %75 = vector.multi_reduction <add>, %74, %cst_33 [0] : vector<2x128xf32> to vector<128xf32>
    %76 = vector.shape_cast %75 : vector<128xf32> to vector<1x128xf32>
    %c1_34 = arith.constant 1 : index
    %c0_35 = arith.constant 0 : index
    %77 = memref.load %arg4[%c1_34, %c0_35] : memref<8x4xf32, #tpu.memory_space<smem>>
    %78 = vector.broadcast %77 : f32 to vector<2x128xf32>
    %79 = arith.mulf %17, %78 : vector<2x128xf32>
    %c1_36 = arith.constant 1 : index
    %c1_37 = arith.constant 1 : index
    %80 = memref.load %arg4[%c1_36, %c1_37] : memref<8x4xf32, #tpu.memory_space<smem>>
    %81 = vector.broadcast %80 : f32 to vector<2x128xf32>
    %82 = arith.mulf %30, %81 : vector<2x128xf32>
    %83 = arith.addf %79, %82 : vector<2x128xf32>
    %c1_38 = arith.constant 1 : index
    %c2_39 = arith.constant 2 : index
    %84 = memref.load %arg4[%c1_38, %c2_39] : memref<8x4xf32, #tpu.memory_space<smem>>
    %85 = vector.broadcast %84 : f32 to vector<2x128xf32>
    %86 = arith.mulf %43, %85 : vector<2x128xf32>
    %87 = arith.addf %83, %86 : vector<2x128xf32>
    %c1_40 = arith.constant 1 : index
    %c3_41 = arith.constant 3 : index
    %88 = memref.load %arg4[%c1_40, %c3_41] : memref<8x4xf32, #tpu.memory_space<smem>>
    %89 = vector.broadcast %88 : f32 to vector<2x128xf32>
    %90 = arith.mulf %56, %89 : vector<2x128xf32>
    %91 = arith.addf %87, %90 : vector<2x128xf32>
    %cst_42 = arith.constant dense<0.000000e+00> : vector<128xf32>
    %92 = vector.multi_reduction <add>, %91, %cst_42 [0] : vector<2x128xf32> to vector<128xf32>
    %93 = vector.shape_cast %92 : vector<128xf32> to vector<1x128xf32>
    %94 = arith.mulf %91, %91 : vector<2x128xf32>
    %cst_43 = arith.constant dense<0.000000e+00> : vector<128xf32>
    %95 = vector.multi_reduction <add>, %94, %cst_43 [0] : vector<2x128xf32> to vector<128xf32>
    %96 = vector.shape_cast %95 : vector<128xf32> to vector<1x128xf32>
    %c2_44 = arith.constant 2 : index
    %c0_45 = arith.constant 0 : index
    %97 = memref.load %arg4[%c2_44, %c0_45] : memref<8x4xf32, #tpu.memory_space<smem>>
    %98 = vector.broadcast %97 : f32 to vector<2x128xf32>
    %99 = arith.mulf %17, %98 : vector<2x128xf32>
    %c2_46 = arith.constant 2 : index
    %c1_47 = arith.constant 1 : index
    %100 = memref.load %arg4[%c2_46, %c1_47] : memref<8x4xf32, #tpu.memory_space<smem>>
    %101 = vector.broadcast %100 : f32 to vector<2x128xf32>
    %102 = arith.mulf %30, %101 : vector<2x128xf32>
    %103 = arith.addf %99, %102 : vector<2x128xf32>
    %c2_48 = arith.constant 2 : index
    %c2_49 = arith.constant 2 : index
    %104 = memref.load %arg4[%c2_48, %c2_49] : memref<8x4xf32, #tpu.memory_space<smem>>
    %105 = vector.broadcast %104 : f32 to vector<2x128xf32>
    %106 = arith.mulf %43, %105 : vector<2x128xf32>
    %107 = arith.addf %103, %106 : vector<2x128xf32>
    %c2_50 = arith.constant 2 : index
    %c3_51 = arith.constant 3 : index
    %108 = memref.load %arg4[%c2_50, %c3_51] : memref<8x4xf32, #tpu.memory_space<smem>>
    %109 = vector.broadcast %108 : f32 to vector<2x128xf32>
    %110 = arith.mulf %56, %109 : vector<2x128xf32>
    %111 = arith.addf %107, %110 : vector<2x128xf32>
    %cst_52 = arith.constant dense<0.000000e+00> : vector<128xf32>
    %112 = vector.multi_reduction <add>, %111, %cst_52 [0] : vector<2x128xf32> to vector<128xf32>
    %113 = vector.shape_cast %112 : vector<128xf32> to vector<1x128xf32>
    %114 = arith.mulf %111, %111 : vector<2x128xf32>
    %cst_53 = arith.constant dense<0.000000e+00> : vector<128xf32>
    %115 = vector.multi_reduction <add>, %114, %cst_53 [0] : vector<2x128xf32> to vector<128xf32>
    %116 = vector.shape_cast %115 : vector<128xf32> to vector<1x128xf32>
    %c3_54 = arith.constant 3 : index
    %c0_55 = arith.constant 0 : index
    %117 = memref.load %arg4[%c3_54, %c0_55] : memref<8x4xf32, #tpu.memory_space<smem>>
    %118 = vector.broadcast %117 : f32 to vector<2x128xf32>
    %119 = arith.mulf %17, %118 : vector<2x128xf32>
    %c3_56 = arith.constant 3 : index
    %c1_57 = arith.constant 1 : index
    %120 = memref.load %arg4[%c3_56, %c1_57] : memref<8x4xf32, #tpu.memory_space<smem>>
    %121 = vector.broadcast %120 : f32 to vector<2x128xf32>
    %122 = arith.mulf %30, %121 : vector<2x128xf32>
    %123 = arith.addf %119, %122 : vector<2x128xf32>
    %c3_58 = arith.constant 3 : index
    %c2_59 = arith.constant 2 : index
    %124 = memref.load %arg4[%c3_58, %c2_59] : memref<8x4xf32, #tpu.memory_space<smem>>
    %125 = vector.broadcast %124 : f32 to vector<2x128xf32>
    %126 = arith.mulf %43, %125 : vector<2x128xf32>
    %127 = arith.addf %123, %126 : vector<2x128xf32>
    %c3_60 = arith.constant 3 : index
    %c3_61 = arith.constant 3 : index
    %128 = memref.load %arg4[%c3_60, %c3_61] : memref<8x4xf32, #tpu.memory_space<smem>>
    %129 = vector.broadcast %128 : f32 to vector<2x128xf32>
    %130 = arith.mulf %56, %129 : vector<2x128xf32>
    %131 = arith.addf %127, %130 : vector<2x128xf32>
    %cst_62 = arith.constant dense<0.000000e+00> : vector<128xf32>
    %132 = vector.multi_reduction <add>, %131, %cst_62 [0] : vector<2x128xf32> to vector<128xf32>
    %133 = vector.shape_cast %132 : vector<128xf32> to vector<1x128xf32>
    %134 = arith.mulf %131, %131 : vector<2x128xf32>
    %cst_63 = arith.constant dense<0.000000e+00> : vector<128xf32>
    %135 = vector.multi_reduction <add>, %134, %cst_63 [0] : vector<2x128xf32> to vector<128xf32>
    %136 = vector.shape_cast %135 : vector<128xf32> to vector<1x128xf32>
    %c4 = arith.constant 4 : index
    %c0_64 = arith.constant 0 : index
    %137 = memref.load %arg4[%c4, %c0_64] : memref<8x4xf32, #tpu.memory_space<smem>>
    %138 = vector.broadcast %137 : f32 to vector<2x128xf32>
    %139 = arith.mulf %17, %138 : vector<2x128xf32>
    %c4_65 = arith.constant 4 : index
    %c1_66 = arith.constant 1 : index
    %140 = memref.load %arg4[%c4_65, %c1_66] : memref<8x4xf32, #tpu.memory_space<smem>>
    %141 = vector.broadcast %140 : f32 to vector<2x128xf32>
    %142 = arith.mulf %30, %141 : vector<2x128xf32>
    %143 = arith.addf %139, %142 : vector<2x128xf32>
    %c4_67 = arith.constant 4 : index
    %c2_68 = arith.constant 2 : index
    %144 = memref.load %arg4[%c4_67, %c2_68] : memref<8x4xf32, #tpu.memory_space<smem>>
    %145 = vector.broadcast %144 : f32 to vector<2x128xf32>
    %146 = arith.mulf %43, %145 : vector<2x128xf32>
    %147 = arith.addf %143, %146 : vector<2x128xf32>
    %c4_69 = arith.constant 4 : index
    %c3_70 = arith.constant 3 : index
    %148 = memref.load %arg4[%c4_69, %c3_70] : memref<8x4xf32, #tpu.memory_space<smem>>
    %149 = vector.broadcast %148 : f32 to vector<2x128xf32>
    %150 = arith.mulf %56, %149 : vector<2x128xf32>
    %151 = arith.addf %147, %150 : vector<2x128xf32>
    %cst_71 = arith.constant dense<0.000000e+00> : vector<128xf32>
    %152 = vector.multi_reduction <add>, %151, %cst_71 [0] : vector<2x128xf32> to vector<128xf32>
    %153 = vector.shape_cast %152 : vector<128xf32> to vector<1x128xf32>
    %154 = arith.mulf %151, %151 : vector<2x128xf32>
    %cst_72 = arith.constant dense<0.000000e+00> : vector<128xf32>
    %155 = vector.multi_reduction <add>, %154, %cst_72 [0] : vector<2x128xf32> to vector<128xf32>
    %156 = vector.shape_cast %155 : vector<128xf32> to vector<1x128xf32>
    %c5 = arith.constant 5 : index
    %c0_73 = arith.constant 0 : index
    %157 = memref.load %arg4[%c5, %c0_73] : memref<8x4xf32, #tpu.memory_space<smem>>
    %158 = vector.broadcast %157 : f32 to vector<2x128xf32>
    %159 = arith.mulf %17, %158 : vector<2x128xf32>
    %c5_74 = arith.constant 5 : index
    %c1_75 = arith.constant 1 : index
    %160 = memref.load %arg4[%c5_74, %c1_75] : memref<8x4xf32, #tpu.memory_space<smem>>
    %161 = vector.broadcast %160 : f32 to vector<2x128xf32>
    %162 = arith.mulf %30, %161 : vector<2x128xf32>
    %163 = arith.addf %159, %162 : vector<2x128xf32>
    %c5_76 = arith.constant 5 : index
    %c2_77 = arith.constant 2 : index
    %164 = memref.load %arg4[%c5_76, %c2_77] : memref<8x4xf32, #tpu.memory_space<smem>>
    %165 = vector.broadcast %164 : f32 to vector<2x128xf32>
    %166 = arith.mulf %43, %165 : vector<2x128xf32>
    %167 = arith.addf %163, %166 : vector<2x128xf32>
    %c5_78 = arith.constant 5 : index
    %c3_79 = arith.constant 3 : index
    %168 = memref.load %arg4[%c5_78, %c3_79] : memref<8x4xf32, #tpu.memory_space<smem>>
    %169 = vector.broadcast %168 : f32 to vector<2x128xf32>
    %170 = arith.mulf %56, %169 : vector<2x128xf32>
    %171 = arith.addf %167, %170 : vector<2x128xf32>
    %cst_80 = arith.constant dense<0.000000e+00> : vector<128xf32>
    %172 = vector.multi_reduction <add>, %171, %cst_80 [0] : vector<2x128xf32> to vector<128xf32>
    %173 = vector.shape_cast %172 : vector<128xf32> to vector<1x128xf32>
    %174 = arith.mulf %171, %171 : vector<2x128xf32>
    %cst_81 = arith.constant dense<0.000000e+00> : vector<128xf32>
    %175 = vector.multi_reduction <add>, %174, %cst_81 [0] : vector<2x128xf32> to vector<128xf32>
    %176 = vector.shape_cast %175 : vector<128xf32> to vector<1x128xf32>
    %c6 = arith.constant 6 : index
    %c0_82 = arith.constant 0 : index
    %177 = memref.load %arg4[%c6, %c0_82] : memref<8x4xf32, #tpu.memory_space<smem>>
    %178 = vector.broadcast %177 : f32 to vector<2x128xf32>
    %179 = arith.mulf %17, %178 : vector<2x128xf32>
    %c6_83 = arith.constant 6 : index
    %c1_84 = arith.constant 1 : index
    %180 = memref.load %arg4[%c6_83, %c1_84] : memref<8x4xf32, #tpu.memory_space<smem>>
    %181 = vector.broadcast %180 : f32 to vector<2x128xf32>
    %182 = arith.mulf %30, %181 : vector<2x128xf32>
    %183 = arith.addf %179, %182 : vector<2x128xf32>
    %c6_85 = arith.constant 6 : index
    %c2_86 = arith.constant 2 : index
    %184 = memref.load %arg4[%c6_85, %c2_86] : memref<8x4xf32, #tpu.memory_space<smem>>
    %185 = vector.broadcast %184 : f32 to vector<2x128xf32>
    %186 = arith.mulf %43, %185 : vector<2x128xf32>
    %187 = arith.addf %183, %186 : vector<2x128xf32>
    %c6_87 = arith.constant 6 : index
    %c3_88 = arith.constant 3 : index
    %188 = memref.load %arg4[%c6_87, %c3_88] : memref<8x4xf32, #tpu.memory_space<smem>>
    %189 = vector.broadcast %188 : f32 to vector<2x128xf32>
    %190 = arith.mulf %56, %189 : vector<2x128xf32>
    %191 = arith.addf %187, %190 : vector<2x128xf32>
    %cst_89 = arith.constant dense<0.000000e+00> : vector<128xf32>
    %192 = vector.multi_reduction <add>, %191, %cst_89 [0] : vector<2x128xf32> to vector<128xf32>
    %193 = vector.shape_cast %192 : vector<128xf32> to vector<1x128xf32>
    %194 = arith.mulf %191, %191 : vector<2x128xf32>
    %cst_90 = arith.constant dense<0.000000e+00> : vector<128xf32>
    %195 = vector.multi_reduction <add>, %194, %cst_90 [0] : vector<2x128xf32> to vector<128xf32>
    %196 = vector.shape_cast %195 : vector<128xf32> to vector<1x128xf32>
    %c7 = arith.constant 7 : index
    %c0_91 = arith.constant 0 : index
    %197 = memref.load %arg4[%c7, %c0_91] : memref<8x4xf32, #tpu.memory_space<smem>>
    %198 = vector.broadcast %197 : f32 to vector<2x128xf32>
    %199 = arith.mulf %17, %198 : vector<2x128xf32>
    %c7_92 = arith.constant 7 : index
    %c1_93 = arith.constant 1 : index
    %200 = memref.load %arg4[%c7_92, %c1_93] : memref<8x4xf32, #tpu.memory_space<smem>>
    %201 = vector.broadcast %200 : f32 to vector<2x128xf32>
    %202 = arith.mulf %30, %201 : vector<2x128xf32>
    %203 = arith.addf %199, %202 : vector<2x128xf32>
    %c7_94 = arith.constant 7 : index
    %c2_95 = arith.constant 2 : index
    %204 = memref.load %arg4[%c7_94, %c2_95] : memref<8x4xf32, #tpu.memory_space<smem>>
    %205 = vector.broadcast %204 : f32 to vector<2x128xf32>
    %206 = arith.mulf %43, %205 : vector<2x128xf32>
    %207 = arith.addf %203, %206 : vector<2x128xf32>
    %c7_96 = arith.constant 7 : index
    %c3_97 = arith.constant 3 : index
    %208 = memref.load %arg4[%c7_96, %c3_97] : memref<8x4xf32, #tpu.memory_space<smem>>
    %209 = vector.broadcast %208 : f32 to vector<2x128xf32>
    %210 = arith.mulf %56, %209 : vector<2x128xf32>
    %211 = arith.addf %207, %210 : vector<2x128xf32>
    %cst_98 = arith.constant dense<0.000000e+00> : vector<128xf32>
    %212 = vector.multi_reduction <add>, %211, %cst_98 [0] : vector<2x128xf32> to vector<128xf32>
    %213 = vector.shape_cast %212 : vector<128xf32> to vector<1x128xf32>
    %214 = arith.mulf %211, %211 : vector<2x128xf32>
    %cst_99 = arith.constant dense<0.000000e+00> : vector<128xf32>
    %215 = vector.multi_reduction <add>, %214, %cst_99 [0] : vector<2x128xf32> to vector<128xf32>
    %216 = vector.shape_cast %215 : vector<128xf32> to vector<1x128xf32>
    %c0_100 = arith.constant 0 : index
    %c0_101 = arith.constant 0 : index
    %c0_102 = arith.constant 0 : index
    %217 = vector.load %arg5[%c0_100, %c0_101, %c0_102] : memref<1x8x128xf32, #tpu.memory_space<vmem>>, vector<1x8x128xf32>
    %218 = vector.shape_cast %217 : vector<1x8x128xf32> to vector<8x128xf32>
    %219 = tpu.concatenate %73, %93, %113, %133, %153, %173, %193, %213 in 0 : vector<1x128xf32>, vector<1x128xf32>, vector<1x128xf32>, vector<1x128xf32>, vector<1x128xf32>, vector<1x128xf32>, vector<1x128xf32>, vector<1x128xf32> -> vector<8x128xf32>
    %220 = arith.addf %218, %219 : vector<8x128xf32>
    %c0_103 = arith.constant 0 : index
    %c0_104 = arith.constant 0 : index
    %c0_105 = arith.constant 0 : index
    %221 = vector.load %arg5[%c0_103, %c0_104, %c0_105] : memref<1x8x128xf32, #tpu.memory_space<vmem>>, vector<1x8x128xf32>
    %222 = vector.shape_cast %221 : vector<1x8x128xf32> to vector<8x128xf32>
    %223 = vector.shape_cast %220 : vector<8x128xf32> to vector<1x8x128xf32>
    tpu.vector_store %arg5[%c0_103, %c0_104, %c0_105], %223 {strides = array<i32>} : memref<1x8x128xf32, #tpu.memory_space<vmem>>, vector<1x8x128xf32>,
    %c0_106 = arith.constant 0 : index
    %c0_107 = arith.constant 0 : index
    %c0_108 = arith.constant 0 : index
    %224 = vector.load %arg6[%c0_106, %c0_107, %c0_108] : memref<1x8x128xf32, #tpu.memory_space<vmem>>, vector<1x8x128xf32>
    %225 = vector.shape_cast %224 : vector<1x8x128xf32> to vector<8x128xf32>
    %226 = tpu.concatenate %76, %96, %116, %136, %156, %176, %196, %216 in 0 : vector<1x128xf32>, vector<1x128xf32>, vector<1x128xf32>, vector<1x128xf32>, vector<1x128xf32>, vector<1x128xf32>, vector<1x128xf32>, vector<1x128xf32> -> vector<8x128xf32>
    %227 = arith.addf %225, %226 : vector<8x128xf32>
    %c0_109 = arith.constant 0 : index
    %c0_110 = arith.constant 0 : index
    %c0_111 = arith.constant 0 : index
    %228 = vector.load %arg6[%c0_109, %c0_110, %c0_111] : memref<1x8x128xf32, #tpu.memory_space<vmem>>, vector<1x8x128xf32>
    %229 = vector.shape_cast %228 : vector<1x8x128xf32> to vector<8x128xf32>
    %230 = vector.shape_cast %227 : vector<8x128xf32> to vector<1x8x128xf32>
    tpu.vector_store %arg6[%c0_109, %c0_110, %c0_111], %230 {strides = array<i32>} : memref<1x8x128xf32, #tpu.memory_space<vmem>>, vector<1x8x128xf32>,
    return
  }
  func.func @transform_0(%arg0: i32, %arg1: i32) -> (i32, i32, i32, i32) {
    %c0_i32 = arith.constant 0 : i32
    %c0_i32_0 = arith.constant 0 : i32
    %c0_i32_1 = arith.constant 0 : i32
    return %arg0, %c0_i32, %arg1, %c0_i32_0 : i32, i32, i32, i32
  }
  func.func @transform_1(%arg0: i32, %arg1: i32) -> (i32, i32) {
    %c0_i32 = arith.constant 0 : i32
    %c0_i32_0 = arith.constant 0 : i32
    %c0_i32_1 = arith.constant 0 : i32
    return %c0_i32, %c0_i32_0 : i32, i32
  }
  func.func @transform_2(%arg0: i32, %arg1: i32) -> (i32, i32) {
    %c0_i32 = arith.constant 0 : i32
    %c0_i32_0 = arith.constant 0 : i32
    %c0_i32_1 = arith.constant 0 : i32
    return %c0_i32, %c0_i32_0 : i32, i32
  }
  func.func @transform_3(%arg0: i32, %arg1: i32) -> (i32, i32, i32) {
    %c0_i32 = arith.constant 0 : i32
    %c0_i32_0 = arith.constant 0 : i32
    %c0_i32_1 = arith.constant 0 : i32
    return %arg0, %c0_i32, %c0_i32_0 : i32, i32, i32
  }
  func.func @transform_4(%arg0: i32, %arg1: i32) -> (i32, i32, i32) {
    %c0_i32 = arith.constant 0 : i32
    %c0_i32_0 = arith.constant 0 : i32
    %c0_i32_1 = arith.constant 0 : i32
    return %arg0, %c0_i32, %c0_i32_0 : i32, i32, i32
  }
}

module attributes {stable_mosaic.version = 11 : i64} {
  func.func @_apply_px_kernel(%arg0: i32, %arg1: i32, %arg2: memref<1x4x2x128xf32, #tpu.memory_space<vmem>>, %arg3: memref<2x4xf32, #tpu.memory_space<smem>>, %arg4: memref<8x4xf32, #tpu.memory_space<smem>>, %arg5: memref<2x8xf32, #tpu.memory_space<smem>>, %arg6: memref<1x8x2x128xf32, #tpu.memory_space<vmem>>) attributes {dimension_semantics = [#tpu.dimension_semantics<parallel>, #tpu.dimension_semantics<parallel>], iteration_bounds = array<i64: 2, 1>, scalar_prefetch = 0 : i64, scratch_operands = 0 : i64, tpu.core_type = #tpu.core_type<tc>, window_params = [{transform_indices = @transform_0, window_bounds = array<i64: 1, 4, 2, 128>}, {transform_indices = @transform_1, window_bounds = array<i64: 2, 4>}, {transform_indices = @transform_2, window_bounds = array<i64: 8, 4>}, {transform_indices = @transform_3, window_bounds = array<i64: 2, 8>}, {transform_indices = @transform_4, window_bounds = array<i64: 1, 8, 2, 128>}]} {
    %c0 = arith.constant 0 : index
    %c0_0 = arith.constant 0 : index
    %c0_1 = arith.constant 0 : index
    %c0_2 = arith.constant 0 : index
    %0 = vector.load %arg2[%c0, %c0_0, %c0_1, %c0_2] : memref<1x4x2x128xf32, #tpu.memory_space<vmem>>, vector<1x4x2x128xf32>
    %1 = vector.shape_cast %0 : vector<1x4x2x128xf32> to vector<4x2x128xf32>
    %c0_3 = arith.constant 0 : index
    %c0_4 = arith.constant 0 : index
    %2 = memref.load %arg3[%c0_3, %c0_4] : memref<2x4xf32, #tpu.memory_space<smem>>
    %3 = vector.extract_strided_slice %1 {offsets = [0, 0, 0], sizes = [1, 2, 128], strides = [1, 1, 1]} : vector<4x2x128xf32> to vector<1x2x128xf32>
    %4 = vector.shape_cast %3 : vector<1x2x128xf32> to vector<2x128xf32>
    %5 = vector.broadcast %2 : f32 to vector<2x128xf32>
    %6 = arith.mulf %5, %4 : vector<2x128xf32>
    %c1 = arith.constant 1 : index
    %c0_5 = arith.constant 0 : index
    %7 = memref.load %arg3[%c1, %c0_5] : memref<2x4xf32, #tpu.memory_space<smem>>
    %8 = vector.broadcast %7 : f32 to vector<2x128xf32>
    %9 = arith.addf %6, %8 : vector<2x128xf32>
    %cst = arith.constant 0.000000e+00 : f32
    %10 = vector.broadcast %cst : f32 to vector<2x128xf32>
    %11 = arith.cmpf oge, %9, %10 : vector<2x128xf32>
    %cst_6 = arith.constant 1.000000e-01 : f32
    %12 = vector.broadcast %cst_6 : f32 to vector<2x128xf32>
    %13 = arith.mulf %12, %9 : vector<2x128xf32>
    %14 = arith.select %11, %9, %13 : vector<2x128xi1>, vector<2x128xf32>
    %c0_7 = arith.constant 0 : index
    %c1_8 = arith.constant 1 : index
    %15 = memref.load %arg3[%c0_7, %c1_8] : memref<2x4xf32, #tpu.memory_space<smem>>
    %16 = vector.extract_strided_slice %1 {offsets = [1, 0, 0], sizes = [1, 2, 128], strides = [1, 1, 1]} : vector<4x2x128xf32> to vector<1x2x128xf32>
    %17 = vector.shape_cast %16 : vector<1x2x128xf32> to vector<2x128xf32>
    %18 = vector.broadcast %15 : f32 to vector<2x128xf32>
    %19 = arith.mulf %18, %17 : vector<2x128xf32>
    %c1_9 = arith.constant 1 : index
    %c1_10 = arith.constant 1 : index
    %20 = memref.load %arg3[%c1_9, %c1_10] : memref<2x4xf32, #tpu.memory_space<smem>>
    %21 = vector.broadcast %20 : f32 to vector<2x128xf32>
    %22 = arith.addf %19, %21 : vector<2x128xf32>
    %cst_11 = arith.constant 0.000000e+00 : f32
    %23 = vector.broadcast %cst_11 : f32 to vector<2x128xf32>
    %24 = arith.cmpf oge, %22, %23 : vector<2x128xf32>
    %cst_12 = arith.constant 1.000000e-01 : f32
    %25 = vector.broadcast %cst_12 : f32 to vector<2x128xf32>
    %26 = arith.mulf %25, %22 : vector<2x128xf32>
    %27 = arith.select %24, %22, %26 : vector<2x128xi1>, vector<2x128xf32>
    %c0_13 = arith.constant 0 : index
    %c2 = arith.constant 2 : index
    %28 = memref.load %arg3[%c0_13, %c2] : memref<2x4xf32, #tpu.memory_space<smem>>
    %29 = vector.extract_strided_slice %1 {offsets = [2, 0, 0], sizes = [1, 2, 128], strides = [1, 1, 1]} : vector<4x2x128xf32> to vector<1x2x128xf32>
    %30 = vector.shape_cast %29 : vector<1x2x128xf32> to vector<2x128xf32>
    %31 = vector.broadcast %28 : f32 to vector<2x128xf32>
    %32 = arith.mulf %31, %30 : vector<2x128xf32>
    %c1_14 = arith.constant 1 : index
    %c2_15 = arith.constant 2 : index
    %33 = memref.load %arg3[%c1_14, %c2_15] : memref<2x4xf32, #tpu.memory_space<smem>>
    %34 = vector.broadcast %33 : f32 to vector<2x128xf32>
    %35 = arith.addf %32, %34 : vector<2x128xf32>
    %cst_16 = arith.constant 0.000000e+00 : f32
    %36 = vector.broadcast %cst_16 : f32 to vector<2x128xf32>
    %37 = arith.cmpf oge, %35, %36 : vector<2x128xf32>
    %cst_17 = arith.constant 1.000000e-01 : f32
    %38 = vector.broadcast %cst_17 : f32 to vector<2x128xf32>
    %39 = arith.mulf %38, %35 : vector<2x128xf32>
    %40 = arith.select %37, %35, %39 : vector<2x128xi1>, vector<2x128xf32>
    %c0_18 = arith.constant 0 : index
    %c3 = arith.constant 3 : index
    %41 = memref.load %arg3[%c0_18, %c3] : memref<2x4xf32, #tpu.memory_space<smem>>
    %42 = vector.extract_strided_slice %1 {offsets = [3, 0, 0], sizes = [1, 2, 128], strides = [1, 1, 1]} : vector<4x2x128xf32> to vector<1x2x128xf32>
    %43 = vector.shape_cast %42 : vector<1x2x128xf32> to vector<2x128xf32>
    %44 = vector.broadcast %41 : f32 to vector<2x128xf32>
    %45 = arith.mulf %44, %43 : vector<2x128xf32>
    %c1_19 = arith.constant 1 : index
    %c3_20 = arith.constant 3 : index
    %46 = memref.load %arg3[%c1_19, %c3_20] : memref<2x4xf32, #tpu.memory_space<smem>>
    %47 = vector.broadcast %46 : f32 to vector<2x128xf32>
    %48 = arith.addf %45, %47 : vector<2x128xf32>
    %cst_21 = arith.constant 0.000000e+00 : f32
    %49 = vector.broadcast %cst_21 : f32 to vector<2x128xf32>
    %50 = arith.cmpf oge, %48, %49 : vector<2x128xf32>
    %cst_22 = arith.constant 1.000000e-01 : f32
    %51 = vector.broadcast %cst_22 : f32 to vector<2x128xf32>
    %52 = arith.mulf %51, %48 : vector<2x128xf32>
    %53 = arith.select %50, %48, %52 : vector<2x128xi1>, vector<2x128xf32>
    %c0_23 = arith.constant 0 : index
    %c0_24 = arith.constant 0 : index
    %54 = memref.load %arg4[%c0_23, %c0_24] : memref<8x4xf32, #tpu.memory_space<smem>>
    %55 = vector.broadcast %54 : f32 to vector<2x128xf32>
    %56 = arith.mulf %14, %55 : vector<2x128xf32>
    %c0_25 = arith.constant 0 : index
    %c1_26 = arith.constant 1 : index
    %57 = memref.load %arg4[%c0_25, %c1_26] : memref<8x4xf32, #tpu.memory_space<smem>>
    %58 = vector.broadcast %57 : f32 to vector<2x128xf32>
    %59 = arith.mulf %27, %58 : vector<2x128xf32>
    %60 = arith.addf %56, %59 : vector<2x128xf32>
    %c0_27 = arith.constant 0 : index
    %c2_28 = arith.constant 2 : index
    %61 = memref.load %arg4[%c0_27, %c2_28] : memref<8x4xf32, #tpu.memory_space<smem>>
    %62 = vector.broadcast %61 : f32 to vector<2x128xf32>
    %63 = arith.mulf %40, %62 : vector<2x128xf32>
    %64 = arith.addf %60, %63 : vector<2x128xf32>
    %c0_29 = arith.constant 0 : index
    %c3_30 = arith.constant 3 : index
    %65 = memref.load %arg4[%c0_29, %c3_30] : memref<8x4xf32, #tpu.memory_space<smem>>
    %66 = vector.broadcast %65 : f32 to vector<2x128xf32>
    %67 = arith.mulf %53, %66 : vector<2x128xf32>
    %68 = arith.addf %64, %67 : vector<2x128xf32>
    %c0_31 = arith.constant 0 : index
    %c0_32 = arith.constant 0 : index
    %69 = memref.load %arg5[%c0_31, %c0_32] : memref<2x8xf32, #tpu.memory_space<smem>>
    %70 = vector.broadcast %69 : f32 to vector<2x128xf32>
    %71 = arith.mulf %70, %68 : vector<2x128xf32>
    %c1_33 = arith.constant 1 : index
    %c0_34 = arith.constant 0 : index
    %72 = memref.load %arg5[%c1_33, %c0_34] : memref<2x8xf32, #tpu.memory_space<smem>>
    %73 = vector.broadcast %72 : f32 to vector<2x128xf32>
    %74 = arith.addf %71, %73 : vector<2x128xf32>
    %cst_35 = arith.constant 0.000000e+00 : f32
    %75 = vector.broadcast %cst_35 : f32 to vector<2x128xf32>
    %76 = arith.cmpf oge, %74, %75 : vector<2x128xf32>
    %cst_36 = arith.constant 1.000000e-01 : f32
    %77 = vector.broadcast %cst_36 : f32 to vector<2x128xf32>
    %78 = arith.mulf %77, %74 : vector<2x128xf32>
    %79 = arith.select %76, %74, %78 : vector<2x128xi1>, vector<2x128xf32>
    %c0_37 = arith.constant 0 : index
    %c0_38 = arith.constant 0 : index
    %c0_39 = arith.constant 0 : index
    %c0_40 = arith.constant 0 : index
    %80 = vector.load %arg6[%c0_37, %c0_38, %c0_39, %c0_40] : memref<1x8x2x128xf32, #tpu.memory_space<vmem>>, vector<1x1x2x128xf32>
    %81 = vector.shape_cast %80 : vector<1x1x2x128xf32> to vector<2x128xf32>
    %82 = vector.shape_cast %79 : vector<2x128xf32> to vector<1x1x2x128xf32>
    tpu.vector_store %arg6[%c0_37, %c0_38, %c0_39, %c0_40], %82 {strides = array<i32>} : memref<1x8x2x128xf32, #tpu.memory_space<vmem>>, vector<1x1x2x128xf32>,
    %c1_41 = arith.constant 1 : index
    %c0_42 = arith.constant 0 : index
    %83 = memref.load %arg4[%c1_41, %c0_42] : memref<8x4xf32, #tpu.memory_space<smem>>
    %84 = vector.broadcast %83 : f32 to vector<2x128xf32>
    %85 = arith.mulf %14, %84 : vector<2x128xf32>
    %c1_43 = arith.constant 1 : index
    %c1_44 = arith.constant 1 : index
    %86 = memref.load %arg4[%c1_43, %c1_44] : memref<8x4xf32, #tpu.memory_space<smem>>
    %87 = vector.broadcast %86 : f32 to vector<2x128xf32>
    %88 = arith.mulf %27, %87 : vector<2x128xf32>
    %89 = arith.addf %85, %88 : vector<2x128xf32>
    %c1_45 = arith.constant 1 : index
    %c2_46 = arith.constant 2 : index
    %90 = memref.load %arg4[%c1_45, %c2_46] : memref<8x4xf32, #tpu.memory_space<smem>>
    %91 = vector.broadcast %90 : f32 to vector<2x128xf32>
    %92 = arith.mulf %40, %91 : vector<2x128xf32>
    %93 = arith.addf %89, %92 : vector<2x128xf32>
    %c1_47 = arith.constant 1 : index
    %c3_48 = arith.constant 3 : index
    %94 = memref.load %arg4[%c1_47, %c3_48] : memref<8x4xf32, #tpu.memory_space<smem>>
    %95 = vector.broadcast %94 : f32 to vector<2x128xf32>
    %96 = arith.mulf %53, %95 : vector<2x128xf32>
    %97 = arith.addf %93, %96 : vector<2x128xf32>
    %c0_49 = arith.constant 0 : index
    %c1_50 = arith.constant 1 : index
    %98 = memref.load %arg5[%c0_49, %c1_50] : memref<2x8xf32, #tpu.memory_space<smem>>
    %99 = vector.broadcast %98 : f32 to vector<2x128xf32>
    %100 = arith.mulf %99, %97 : vector<2x128xf32>
    %c1_51 = arith.constant 1 : index
    %c1_52 = arith.constant 1 : index
    %101 = memref.load %arg5[%c1_51, %c1_52] : memref<2x8xf32, #tpu.memory_space<smem>>
    %102 = vector.broadcast %101 : f32 to vector<2x128xf32>
    %103 = arith.addf %100, %102 : vector<2x128xf32>
    %cst_53 = arith.constant 0.000000e+00 : f32
    %104 = vector.broadcast %cst_53 : f32 to vector<2x128xf32>
    %105 = arith.cmpf oge, %103, %104 : vector<2x128xf32>
    %cst_54 = arith.constant 1.000000e-01 : f32
    %106 = vector.broadcast %cst_54 : f32 to vector<2x128xf32>
    %107 = arith.mulf %106, %103 : vector<2x128xf32>
    %108 = arith.select %105, %103, %107 : vector<2x128xi1>, vector<2x128xf32>
    %c0_55 = arith.constant 0 : index
    %c1_56 = arith.constant 1 : index
    %c0_57 = arith.constant 0 : index
    %c0_58 = arith.constant 0 : index
    %109 = vector.load %arg6[%c0_55, %c1_56, %c0_57, %c0_58] : memref<1x8x2x128xf32, #tpu.memory_space<vmem>>, vector<1x1x2x128xf32>
    %110 = vector.shape_cast %109 : vector<1x1x2x128xf32> to vector<2x128xf32>
    %111 = vector.shape_cast %108 : vector<2x128xf32> to vector<1x1x2x128xf32>
    tpu.vector_store %arg6[%c0_55, %c1_56, %c0_57, %c0_58], %111 {strides = array<i32>} : memref<1x8x2x128xf32, #tpu.memory_space<vmem>>, vector<1x1x2x128xf32>,
    %c2_59 = arith.constant 2 : index
    %c0_60 = arith.constant 0 : index
    %112 = memref.load %arg4[%c2_59, %c0_60] : memref<8x4xf32, #tpu.memory_space<smem>>
    %113 = vector.broadcast %112 : f32 to vector<2x128xf32>
    %114 = arith.mulf %14, %113 : vector<2x128xf32>
    %c2_61 = arith.constant 2 : index
    %c1_62 = arith.constant 1 : index
    %115 = memref.load %arg4[%c2_61, %c1_62] : memref<8x4xf32, #tpu.memory_space<smem>>
    %116 = vector.broadcast %115 : f32 to vector<2x128xf32>
    %117 = arith.mulf %27, %116 : vector<2x128xf32>
    %118 = arith.addf %114, %117 : vector<2x128xf32>
    %c2_63 = arith.constant 2 : index
    %c2_64 = arith.constant 2 : index
    %119 = memref.load %arg4[%c2_63, %c2_64] : memref<8x4xf32, #tpu.memory_space<smem>>
    %120 = vector.broadcast %119 : f32 to vector<2x128xf32>
    %121 = arith.mulf %40, %120 : vector<2x128xf32>
    %122 = arith.addf %118, %121 : vector<2x128xf32>
    %c2_65 = arith.constant 2 : index
    %c3_66 = arith.constant 3 : index
    %123 = memref.load %arg4[%c2_65, %c3_66] : memref<8x4xf32, #tpu.memory_space<smem>>
    %124 = vector.broadcast %123 : f32 to vector<2x128xf32>
    %125 = arith.mulf %53, %124 : vector<2x128xf32>
    %126 = arith.addf %122, %125 : vector<2x128xf32>
    %c0_67 = arith.constant 0 : index
    %c2_68 = arith.constant 2 : index
    %127 = memref.load %arg5[%c0_67, %c2_68] : memref<2x8xf32, #tpu.memory_space<smem>>
    %128 = vector.broadcast %127 : f32 to vector<2x128xf32>
    %129 = arith.mulf %128, %126 : vector<2x128xf32>
    %c1_69 = arith.constant 1 : index
    %c2_70 = arith.constant 2 : index
    %130 = memref.load %arg5[%c1_69, %c2_70] : memref<2x8xf32, #tpu.memory_space<smem>>
    %131 = vector.broadcast %130 : f32 to vector<2x128xf32>
    %132 = arith.addf %129, %131 : vector<2x128xf32>
    %cst_71 = arith.constant 0.000000e+00 : f32
    %133 = vector.broadcast %cst_71 : f32 to vector<2x128xf32>
    %134 = arith.cmpf oge, %132, %133 : vector<2x128xf32>
    %cst_72 = arith.constant 1.000000e-01 : f32
    %135 = vector.broadcast %cst_72 : f32 to vector<2x128xf32>
    %136 = arith.mulf %135, %132 : vector<2x128xf32>
    %137 = arith.select %134, %132, %136 : vector<2x128xi1>, vector<2x128xf32>
    %c0_73 = arith.constant 0 : index
    %c2_74 = arith.constant 2 : index
    %c0_75 = arith.constant 0 : index
    %c0_76 = arith.constant 0 : index
    %138 = vector.load %arg6[%c0_73, %c2_74, %c0_75, %c0_76] : memref<1x8x2x128xf32, #tpu.memory_space<vmem>>, vector<1x1x2x128xf32>
    %139 = vector.shape_cast %138 : vector<1x1x2x128xf32> to vector<2x128xf32>
    %140 = vector.shape_cast %137 : vector<2x128xf32> to vector<1x1x2x128xf32>
    tpu.vector_store %arg6[%c0_73, %c2_74, %c0_75, %c0_76], %140 {strides = array<i32>} : memref<1x8x2x128xf32, #tpu.memory_space<vmem>>, vector<1x1x2x128xf32>,
    %c3_77 = arith.constant 3 : index
    %c0_78 = arith.constant 0 : index
    %141 = memref.load %arg4[%c3_77, %c0_78] : memref<8x4xf32, #tpu.memory_space<smem>>
    %142 = vector.broadcast %141 : f32 to vector<2x128xf32>
    %143 = arith.mulf %14, %142 : vector<2x128xf32>
    %c3_79 = arith.constant 3 : index
    %c1_80 = arith.constant 1 : index
    %144 = memref.load %arg4[%c3_79, %c1_80] : memref<8x4xf32, #tpu.memory_space<smem>>
    %145 = vector.broadcast %144 : f32 to vector<2x128xf32>
    %146 = arith.mulf %27, %145 : vector<2x128xf32>
    %147 = arith.addf %143, %146 : vector<2x128xf32>
    %c3_81 = arith.constant 3 : index
    %c2_82 = arith.constant 2 : index
    %148 = memref.load %arg4[%c3_81, %c2_82] : memref<8x4xf32, #tpu.memory_space<smem>>
    %149 = vector.broadcast %148 : f32 to vector<2x128xf32>
    %150 = arith.mulf %40, %149 : vector<2x128xf32>
    %151 = arith.addf %147, %150 : vector<2x128xf32>
    %c3_83 = arith.constant 3 : index
    %c3_84 = arith.constant 3 : index
    %152 = memref.load %arg4[%c3_83, %c3_84] : memref<8x4xf32, #tpu.memory_space<smem>>
    %153 = vector.broadcast %152 : f32 to vector<2x128xf32>
    %154 = arith.mulf %53, %153 : vector<2x128xf32>
    %155 = arith.addf %151, %154 : vector<2x128xf32>
    %c0_85 = arith.constant 0 : index
    %c3_86 = arith.constant 3 : index
    %156 = memref.load %arg5[%c0_85, %c3_86] : memref<2x8xf32, #tpu.memory_space<smem>>
    %157 = vector.broadcast %156 : f32 to vector<2x128xf32>
    %158 = arith.mulf %157, %155 : vector<2x128xf32>
    %c1_87 = arith.constant 1 : index
    %c3_88 = arith.constant 3 : index
    %159 = memref.load %arg5[%c1_87, %c3_88] : memref<2x8xf32, #tpu.memory_space<smem>>
    %160 = vector.broadcast %159 : f32 to vector<2x128xf32>
    %161 = arith.addf %158, %160 : vector<2x128xf32>
    %cst_89 = arith.constant 0.000000e+00 : f32
    %162 = vector.broadcast %cst_89 : f32 to vector<2x128xf32>
    %163 = arith.cmpf oge, %161, %162 : vector<2x128xf32>
    %cst_90 = arith.constant 1.000000e-01 : f32
    %164 = vector.broadcast %cst_90 : f32 to vector<2x128xf32>
    %165 = arith.mulf %164, %161 : vector<2x128xf32>
    %166 = arith.select %163, %161, %165 : vector<2x128xi1>, vector<2x128xf32>
    %c0_91 = arith.constant 0 : index
    %c3_92 = arith.constant 3 : index
    %c0_93 = arith.constant 0 : index
    %c0_94 = arith.constant 0 : index
    %167 = vector.load %arg6[%c0_91, %c3_92, %c0_93, %c0_94] : memref<1x8x2x128xf32, #tpu.memory_space<vmem>>, vector<1x1x2x128xf32>
    %168 = vector.shape_cast %167 : vector<1x1x2x128xf32> to vector<2x128xf32>
    %169 = vector.shape_cast %166 : vector<2x128xf32> to vector<1x1x2x128xf32>
    tpu.vector_store %arg6[%c0_91, %c3_92, %c0_93, %c0_94], %169 {strides = array<i32>} : memref<1x8x2x128xf32, #tpu.memory_space<vmem>>, vector<1x1x2x128xf32>,
    %c4 = arith.constant 4 : index
    %c0_95 = arith.constant 0 : index
    %170 = memref.load %arg4[%c4, %c0_95] : memref<8x4xf32, #tpu.memory_space<smem>>
    %171 = vector.broadcast %170 : f32 to vector<2x128xf32>
    %172 = arith.mulf %14, %171 : vector<2x128xf32>
    %c4_96 = arith.constant 4 : index
    %c1_97 = arith.constant 1 : index
    %173 = memref.load %arg4[%c4_96, %c1_97] : memref<8x4xf32, #tpu.memory_space<smem>>
    %174 = vector.broadcast %173 : f32 to vector<2x128xf32>
    %175 = arith.mulf %27, %174 : vector<2x128xf32>
    %176 = arith.addf %172, %175 : vector<2x128xf32>
    %c4_98 = arith.constant 4 : index
    %c2_99 = arith.constant 2 : index
    %177 = memref.load %arg4[%c4_98, %c2_99] : memref<8x4xf32, #tpu.memory_space<smem>>
    %178 = vector.broadcast %177 : f32 to vector<2x128xf32>
    %179 = arith.mulf %40, %178 : vector<2x128xf32>
    %180 = arith.addf %176, %179 : vector<2x128xf32>
    %c4_100 = arith.constant 4 : index
    %c3_101 = arith.constant 3 : index
    %181 = memref.load %arg4[%c4_100, %c3_101] : memref<8x4xf32, #tpu.memory_space<smem>>
    %182 = vector.broadcast %181 : f32 to vector<2x128xf32>
    %183 = arith.mulf %53, %182 : vector<2x128xf32>
    %184 = arith.addf %180, %183 : vector<2x128xf32>
    %c0_102 = arith.constant 0 : index
    %c4_103 = arith.constant 4 : index
    %185 = memref.load %arg5[%c0_102, %c4_103] : memref<2x8xf32, #tpu.memory_space<smem>>
    %186 = vector.broadcast %185 : f32 to vector<2x128xf32>
    %187 = arith.mulf %186, %184 : vector<2x128xf32>
    %c1_104 = arith.constant 1 : index
    %c4_105 = arith.constant 4 : index
    %188 = memref.load %arg5[%c1_104, %c4_105] : memref<2x8xf32, #tpu.memory_space<smem>>
    %189 = vector.broadcast %188 : f32 to vector<2x128xf32>
    %190 = arith.addf %187, %189 : vector<2x128xf32>
    %cst_106 = arith.constant 0.000000e+00 : f32
    %191 = vector.broadcast %cst_106 : f32 to vector<2x128xf32>
    %192 = arith.cmpf oge, %190, %191 : vector<2x128xf32>
    %cst_107 = arith.constant 1.000000e-01 : f32
    %193 = vector.broadcast %cst_107 : f32 to vector<2x128xf32>
    %194 = arith.mulf %193, %190 : vector<2x128xf32>
    %195 = arith.select %192, %190, %194 : vector<2x128xi1>, vector<2x128xf32>
    %c0_108 = arith.constant 0 : index
    %c4_109 = arith.constant 4 : index
    %c0_110 = arith.constant 0 : index
    %c0_111 = arith.constant 0 : index
    %196 = vector.load %arg6[%c0_108, %c4_109, %c0_110, %c0_111] : memref<1x8x2x128xf32, #tpu.memory_space<vmem>>, vector<1x1x2x128xf32>
    %197 = vector.shape_cast %196 : vector<1x1x2x128xf32> to vector<2x128xf32>
    %198 = vector.shape_cast %195 : vector<2x128xf32> to vector<1x1x2x128xf32>
    tpu.vector_store %arg6[%c0_108, %c4_109, %c0_110, %c0_111], %198 {strides = array<i32>} : memref<1x8x2x128xf32, #tpu.memory_space<vmem>>, vector<1x1x2x128xf32>,
    %c5 = arith.constant 5 : index
    %c0_112 = arith.constant 0 : index
    %199 = memref.load %arg4[%c5, %c0_112] : memref<8x4xf32, #tpu.memory_space<smem>>
    %200 = vector.broadcast %199 : f32 to vector<2x128xf32>
    %201 = arith.mulf %14, %200 : vector<2x128xf32>
    %c5_113 = arith.constant 5 : index
    %c1_114 = arith.constant 1 : index
    %202 = memref.load %arg4[%c5_113, %c1_114] : memref<8x4xf32, #tpu.memory_space<smem>>
    %203 = vector.broadcast %202 : f32 to vector<2x128xf32>
    %204 = arith.mulf %27, %203 : vector<2x128xf32>
    %205 = arith.addf %201, %204 : vector<2x128xf32>
    %c5_115 = arith.constant 5 : index
    %c2_116 = arith.constant 2 : index
    %206 = memref.load %arg4[%c5_115, %c2_116] : memref<8x4xf32, #tpu.memory_space<smem>>
    %207 = vector.broadcast %206 : f32 to vector<2x128xf32>
    %208 = arith.mulf %40, %207 : vector<2x128xf32>
    %209 = arith.addf %205, %208 : vector<2x128xf32>
    %c5_117 = arith.constant 5 : index
    %c3_118 = arith.constant 3 : index
    %210 = memref.load %arg4[%c5_117, %c3_118] : memref<8x4xf32, #tpu.memory_space<smem>>
    %211 = vector.broadcast %210 : f32 to vector<2x128xf32>
    %212 = arith.mulf %53, %211 : vector<2x128xf32>
    %213 = arith.addf %209, %212 : vector<2x128xf32>
    %c0_119 = arith.constant 0 : index
    %c5_120 = arith.constant 5 : index
    %214 = memref.load %arg5[%c0_119, %c5_120] : memref<2x8xf32, #tpu.memory_space<smem>>
    %215 = vector.broadcast %214 : f32 to vector<2x128xf32>
    %216 = arith.mulf %215, %213 : vector<2x128xf32>
    %c1_121 = arith.constant 1 : index
    %c5_122 = arith.constant 5 : index
    %217 = memref.load %arg5[%c1_121, %c5_122] : memref<2x8xf32, #tpu.memory_space<smem>>
    %218 = vector.broadcast %217 : f32 to vector<2x128xf32>
    %219 = arith.addf %216, %218 : vector<2x128xf32>
    %cst_123 = arith.constant 0.000000e+00 : f32
    %220 = vector.broadcast %cst_123 : f32 to vector<2x128xf32>
    %221 = arith.cmpf oge, %219, %220 : vector<2x128xf32>
    %cst_124 = arith.constant 1.000000e-01 : f32
    %222 = vector.broadcast %cst_124 : f32 to vector<2x128xf32>
    %223 = arith.mulf %222, %219 : vector<2x128xf32>
    %224 = arith.select %221, %219, %223 : vector<2x128xi1>, vector<2x128xf32>
    %c0_125 = arith.constant 0 : index
    %c5_126 = arith.constant 5 : index
    %c0_127 = arith.constant 0 : index
    %c0_128 = arith.constant 0 : index
    %225 = vector.load %arg6[%c0_125, %c5_126, %c0_127, %c0_128] : memref<1x8x2x128xf32, #tpu.memory_space<vmem>>, vector<1x1x2x128xf32>
    %226 = vector.shape_cast %225 : vector<1x1x2x128xf32> to vector<2x128xf32>
    %227 = vector.shape_cast %224 : vector<2x128xf32> to vector<1x1x2x128xf32>
    tpu.vector_store %arg6[%c0_125, %c5_126, %c0_127, %c0_128], %227 {strides = array<i32>} : memref<1x8x2x128xf32, #tpu.memory_space<vmem>>, vector<1x1x2x128xf32>,
    %c6 = arith.constant 6 : index
    %c0_129 = arith.constant 0 : index
    %228 = memref.load %arg4[%c6, %c0_129] : memref<8x4xf32, #tpu.memory_space<smem>>
    %229 = vector.broadcast %228 : f32 to vector<2x128xf32>
    %230 = arith.mulf %14, %229 : vector<2x128xf32>
    %c6_130 = arith.constant 6 : index
    %c1_131 = arith.constant 1 : index
    %231 = memref.load %arg4[%c6_130, %c1_131] : memref<8x4xf32, #tpu.memory_space<smem>>
    %232 = vector.broadcast %231 : f32 to vector<2x128xf32>
    %233 = arith.mulf %27, %232 : vector<2x128xf32>
    %234 = arith.addf %230, %233 : vector<2x128xf32>
    %c6_132 = arith.constant 6 : index
    %c2_133 = arith.constant 2 : index
    %235 = memref.load %arg4[%c6_132, %c2_133] : memref<8x4xf32, #tpu.memory_space<smem>>
    %236 = vector.broadcast %235 : f32 to vector<2x128xf32>
    %237 = arith.mulf %40, %236 : vector<2x128xf32>
    %238 = arith.addf %234, %237 : vector<2x128xf32>
    %c6_134 = arith.constant 6 : index
    %c3_135 = arith.constant 3 : index
    %239 = memref.load %arg4[%c6_134, %c3_135] : memref<8x4xf32, #tpu.memory_space<smem>>
    %240 = vector.broadcast %239 : f32 to vector<2x128xf32>
    %241 = arith.mulf %53, %240 : vector<2x128xf32>
    %242 = arith.addf %238, %241 : vector<2x128xf32>
    %c0_136 = arith.constant 0 : index
    %c6_137 = arith.constant 6 : index
    %243 = memref.load %arg5[%c0_136, %c6_137] : memref<2x8xf32, #tpu.memory_space<smem>>
    %244 = vector.broadcast %243 : f32 to vector<2x128xf32>
    %245 = arith.mulf %244, %242 : vector<2x128xf32>
    %c1_138 = arith.constant 1 : index
    %c6_139 = arith.constant 6 : index
    %246 = memref.load %arg5[%c1_138, %c6_139] : memref<2x8xf32, #tpu.memory_space<smem>>
    %247 = vector.broadcast %246 : f32 to vector<2x128xf32>
    %248 = arith.addf %245, %247 : vector<2x128xf32>
    %cst_140 = arith.constant 0.000000e+00 : f32
    %249 = vector.broadcast %cst_140 : f32 to vector<2x128xf32>
    %250 = arith.cmpf oge, %248, %249 : vector<2x128xf32>
    %cst_141 = arith.constant 1.000000e-01 : f32
    %251 = vector.broadcast %cst_141 : f32 to vector<2x128xf32>
    %252 = arith.mulf %251, %248 : vector<2x128xf32>
    %253 = arith.select %250, %248, %252 : vector<2x128xi1>, vector<2x128xf32>
    %c0_142 = arith.constant 0 : index
    %c6_143 = arith.constant 6 : index
    %c0_144 = arith.constant 0 : index
    %c0_145 = arith.constant 0 : index
    %254 = vector.load %arg6[%c0_142, %c6_143, %c0_144, %c0_145] : memref<1x8x2x128xf32, #tpu.memory_space<vmem>>, vector<1x1x2x128xf32>
    %255 = vector.shape_cast %254 : vector<1x1x2x128xf32> to vector<2x128xf32>
    %256 = vector.shape_cast %253 : vector<2x128xf32> to vector<1x1x2x128xf32>
    tpu.vector_store %arg6[%c0_142, %c6_143, %c0_144, %c0_145], %256 {strides = array<i32>} : memref<1x8x2x128xf32, #tpu.memory_space<vmem>>, vector<1x1x2x128xf32>,
    %c7 = arith.constant 7 : index
    %c0_146 = arith.constant 0 : index
    %257 = memref.load %arg4[%c7, %c0_146] : memref<8x4xf32, #tpu.memory_space<smem>>
    %258 = vector.broadcast %257 : f32 to vector<2x128xf32>
    %259 = arith.mulf %14, %258 : vector<2x128xf32>
    %c7_147 = arith.constant 7 : index
    %c1_148 = arith.constant 1 : index
    %260 = memref.load %arg4[%c7_147, %c1_148] : memref<8x4xf32, #tpu.memory_space<smem>>
    %261 = vector.broadcast %260 : f32 to vector<2x128xf32>
    %262 = arith.mulf %27, %261 : vector<2x128xf32>
    %263 = arith.addf %259, %262 : vector<2x128xf32>
    %c7_149 = arith.constant 7 : index
    %c2_150 = arith.constant 2 : index
    %264 = memref.load %arg4[%c7_149, %c2_150] : memref<8x4xf32, #tpu.memory_space<smem>>
    %265 = vector.broadcast %264 : f32 to vector<2x128xf32>
    %266 = arith.mulf %40, %265 : vector<2x128xf32>
    %267 = arith.addf %263, %266 : vector<2x128xf32>
    %c7_151 = arith.constant 7 : index
    %c3_152 = arith.constant 3 : index
    %268 = memref.load %arg4[%c7_151, %c3_152] : memref<8x4xf32, #tpu.memory_space<smem>>
    %269 = vector.broadcast %268 : f32 to vector<2x128xf32>
    %270 = arith.mulf %53, %269 : vector<2x128xf32>
    %271 = arith.addf %267, %270 : vector<2x128xf32>
    %c0_153 = arith.constant 0 : index
    %c7_154 = arith.constant 7 : index
    %272 = memref.load %arg5[%c0_153, %c7_154] : memref<2x8xf32, #tpu.memory_space<smem>>
    %273 = vector.broadcast %272 : f32 to vector<2x128xf32>
    %274 = arith.mulf %273, %271 : vector<2x128xf32>
    %c1_155 = arith.constant 1 : index
    %c7_156 = arith.constant 7 : index
    %275 = memref.load %arg5[%c1_155, %c7_156] : memref<2x8xf32, #tpu.memory_space<smem>>
    %276 = vector.broadcast %275 : f32 to vector<2x128xf32>
    %277 = arith.addf %274, %276 : vector<2x128xf32>
    %cst_157 = arith.constant 0.000000e+00 : f32
    %278 = vector.broadcast %cst_157 : f32 to vector<2x128xf32>
    %279 = arith.cmpf oge, %277, %278 : vector<2x128xf32>
    %cst_158 = arith.constant 1.000000e-01 : f32
    %280 = vector.broadcast %cst_158 : f32 to vector<2x128xf32>
    %281 = arith.mulf %280, %277 : vector<2x128xf32>
    %282 = arith.select %279, %277, %281 : vector<2x128xi1>, vector<2x128xf32>
    %c0_159 = arith.constant 0 : index
    %c7_160 = arith.constant 7 : index
    %c0_161 = arith.constant 0 : index
    %c0_162 = arith.constant 0 : index
    %283 = vector.load %arg6[%c0_159, %c7_160, %c0_161, %c0_162] : memref<1x8x2x128xf32, #tpu.memory_space<vmem>>, vector<1x1x2x128xf32>
    %284 = vector.shape_cast %283 : vector<1x1x2x128xf32> to vector<2x128xf32>
    %285 = vector.shape_cast %282 : vector<2x128xf32> to vector<1x1x2x128xf32>
    tpu.vector_store %arg6[%c0_159, %c7_160, %c0_161, %c0_162], %285 {strides = array<i32>} : memref<1x8x2x128xf32, #tpu.memory_space<vmem>>, vector<1x1x2x128xf32>,
    return
  }
  func.func @transform_0(%arg0: i32, %arg1: i32) -> (i32, i32, i32, i32) {
    %c0_i32 = arith.constant 0 : i32
    %c0_i32_0 = arith.constant 0 : i32
    %c0_i32_1 = arith.constant 0 : i32
    return %arg0, %c0_i32, %arg1, %c0_i32_0 : i32, i32, i32, i32
  }
  func.func @transform_1(%arg0: i32, %arg1: i32) -> (i32, i32) {
    %c0_i32 = arith.constant 0 : i32
    %c0_i32_0 = arith.constant 0 : i32
    %c0_i32_1 = arith.constant 0 : i32
    return %c0_i32, %c0_i32_0 : i32, i32
  }
  func.func @transform_2(%arg0: i32, %arg1: i32) -> (i32, i32) {
    %c0_i32 = arith.constant 0 : i32
    %c0_i32_0 = arith.constant 0 : i32
    %c0_i32_1 = arith.constant 0 : i32
    return %c0_i32, %c0_i32_0 : i32, i32
  }
  func.func @transform_3(%arg0: i32, %arg1: i32) -> (i32, i32) {
    %c0_i32 = arith.constant 0 : i32
    %c0_i32_0 = arith.constant 0 : i32
    %c0_i32_1 = arith.constant 0 : i32
    return %c0_i32, %c0_i32_0 : i32, i32
  }
  func.func @transform_4(%arg0: i32, %arg1: i32) -> (i32, i32, i32, i32) {
    %c0_i32 = arith.constant 0 : i32
    %c0_i32_0 = arith.constant 0 : i32
    %c0_i32_1 = arith.constant 0 : i32
    return %arg0, %c0_i32, %arg1, %c0_i32_0 : i32, i32, i32, i32
  }
}

</mosaic_0001>

<bundles_post_ra>
// kernel: depthwise_separable_conv.3
= control target key start
LH: loop header
LB: loop body
LE: loop exit
PB: predicated region body
PF: predicated region fallthrough
CT: control target
= control target key end

     0   :  { %s436_s9 = smov 0   ;;  %s438_s10 = smov 0   ;;  %s496_s0 = inlined_call_operand.vmem [shape: f32[2,4,2,128], index: 0, kind: input, shape index: {}]   ;;  %s497_s1 = inlined_call_operand.vmem [shape: f32[2,4,128], index: 1, kind: output, shape index: {0}]   ;;  %s498_s2 = inlined_call_operand.vmem [shape: f32[2,4,128], index: 2, kind: output, shape index: {1}]  }
   0x1   :  { %s440_s11 = smov 0  }
   0x2 LB: > { %s25_s12 = sadd.s32 1, %s414_s10  ;;  %p363_p0 = scmp.ge.s32.totalorder %s418_s11, 1  ;;  %s418_s11 = sphi %s440_s11, %s13_s11   ;;  %s414_s10 = sphi %s438_s10, %s500_s10   ;;  %s410_s9 = sphi %s436_s9, %s499_s9  }
   0x3   : > { %p27_p1 = scmp.ge.s32.totalorder %s25_s12, 2  ;;  %p132_p2 = scmp.lt.s32.totalorder %s418_s11, 3 }
   0x5   : > { %s502_s12 = smov (%p27_p1, %s25_s12), 0  ;;  %p133_p3 = pnand %p363_p0, %p132_p2 }
   0x6   : > { %p160_p4 = scmp.lt.s32.totalorder (!%p133_p3), %s410_s9, 1 }
   0x7   : > { %136 = sbr.rel (%p133_p3) target bundleno = 40 (0x28), region = 24 }
   0xc   : > { %s504_s9 = smov (!%p160_p4, %s410_s9), 1  ;;  %vm186_vm0 = vcmask 1041408   ;;  %v420_v0 = vmov 0.0   ;;  %vm248_vm1 = vcmask 1040384   ;;  %vm251_vm2 = vcmask 1042432  }
   0xd   : > { %s370_s13 = sshll.u32 %s504_s9, 3  ;;  %s366_s14 = sshll.u32 %s504_s9, 2 }
   0xe   : > { %s167_s17 = scalar_lea.vmem %s496_s0, %s370_s13  ;;  %s460_s20 = scalar_lea.vmem %s497_s1, %s366_s14 }
   0xf   : > { %180 = vst [vmem:[%s460_s20] sm:$0xf] %v420_v0  ;;  %v182_v1 = vld [vmem:[%s167_s17] sm:$0x3]  ;;  %v183_v2 = vld [vmem:[%s167_s17 + $0x2] sm:$0x3]  ;;  %s466_s23 = scalar_lea.vmem %s498_s2, %s366_s14 }
  0x10   : > { %v184_v3 = vld [vmem:[%s167_s17 + $0x4] sm:$0x3]  ;;  %v187_v4 = vsel %vm186_vm0, %v182_v1, 0.0  ;;  %v194_v5 = vmul.f32 %v182_v1, %v182_v1  ;;  %v202_v6 = vsel %vm186_vm0, %v183_v2, 0.0  ;;  %v209_v7 = vmul.f32 %v183_v2, %v183_v2  ;;  %181 = vst [vmem:[%s466_s23] sm:$0xf] %v420_v0 }
  0x11   : > { %v185_v8 = vld [vmem:[%s167_s17 + $0x6] sm:$0x3]  ;;  %v188_v9 = vrot.slane %v187_v4, 4  ;;  %v203_v10 = vrot.slane %v202_v6, 4  ;;  %v217_v11 = vsel %vm186_vm0, %v184_v3, 0.0  ;;  %v224_v12 = vmul.f32 %v184_v3, %v184_v3 }
  0x12   : > { %v195_v13 = vsel %vm186_vm0, %v194_v5, 0.0  ;;  %v210_v14 = vsel %vm186_vm0, %v209_v7, 0.0  ;;  %v218_v15 = vrot.slane %v217_v11, 4  ;;  %v232_v16 = vsel %vm186_vm0, %v185_v8, 0.0 }
  0x13   : > { %v189_v17 = vadd.f32 %v188_v9, %v187_v4  ;;  %v196_v18 = vrot.slane %v195_v13, 4  ;;  %v204_v19 = vadd.f32 %v203_v10, %v202_v6  ;;  %v211_v20 = vrot.slane %v210_v14, 4 }
  0x14   : > { %v219_v21 = vadd.f32 %v218_v15, %v217_v11  ;;  %v225_v22 = vsel %vm186_vm0, %v224_v12, 0.0  ;;  %v233_v23 = vrot.slane %v232_v16, 4  ;;  %v239_v24 = vmul.f32 %v185_v8, %v185_v8 }
  0x15   : > { %v190_v25 = vrot.slane %v189_v17, 2  ;;  %v197_v26 = vadd.f32 %v196_v18, %v195_v13  ;;  %v205_v27 = vrot.slane %v204_v19, 2  ;;  %v212_v28 = vadd.f32 %v211_v20, %v210_v14 }
  0x16   : > { %v220_v29 = vrot.slane %v219_v21, 2  ;;  %v226_v30 = vrot.slane %v225_v22, 4  ;;  %v234_v31 = vadd.f32 %v233_v23, %v232_v16  ;;  %v240_v32 = vsel %vm186_vm0, %v239_v24, 0.0  ;;  %v247_v61 = vld [vmem:[%s460_s20] sm:$0xf] }
  0x17   : > { %v191_v33 = vadd.f32 %v190_v25, %v189_v17  ;;  %v198_v34 = vrot.slane %v197_v26, 2  ;;  %v206_v35 = vadd.f32 %v205_v27, %v204_v19  ;;  %v213_v36 = vrot.slane %v212_v28, 2  ;;  %v255_v7 = vld [vmem:[%s466_s23] sm:$0xf] }
  0x18   : > { %v227_v37 = vadd.f32 %v226_v30, %v225_v22  ;;  %v241_v38 = vrot.slane %v240_v32, 4  ;;  %v221_v39 = vadd.f32 %v220_v29, %v219_v21  ;;  %v235_v40 = vrot.slane %v234_v31, 2 }
  0x19   : > { %v192_v41 = vrot.slane %v191_v33, 1  ;;  %v207_v42 = vrot.slane %v206_v35, 1  ;;  %v199_v43 = vadd.f32 %v198_v34, %v197_v26  ;;  %v214_v44 = vadd.f32 %v213_v36, %v212_v28 }
  0x1a   : > { %v222_v45 = vrot.slane %v221_v39, 1  ;;  %v236_v46 = vadd.f32 %v235_v40, %v234_v31  ;;  %v228_v47 = vrot.slane %v227_v37, 2  ;;  %v242_v48 = vadd.f32 %v241_v38, %v240_v32 }
  0x1b   : > { %v193_v49 = vadd.f32 %v192_v41, %v191_v33  ;;  %v208_v50 = vadd.f32 %v207_v42, %v206_v35  ;;  %v200_v51 = vrot.slane %v199_v43, 1  ;;  %v215_v52 = vrot.slane %v214_v44, 1 }
  0x1c   : > { %v223_v53 = vadd.f32 %v222_v45, %v221_v39  ;;  %v237_v54 = vrot.slane %v236_v46, 1  ;;  %v229_v55 = vadd.f32 %v228_v47, %v227_v37  ;;  %v243_v56 = vrot.slane %v242_v48, 2 }
  0x1d   : > { %v249_v57 = vsel %vm248_vm1, %v193_v49, %v208_v50  ;;  %v201_v58 = vadd.f32 %v200_v51, %v199_v43  ;;  %v216_v59 = vadd.f32 %v215_v52, %v214_v44 }
  0x1e   : > { %v238_v60 = vadd.f32 %v237_v54, %v236_v46  ;;  %v250_v62 = vsel %vm186_vm0, %v249_v57, %v223_v53  ;;  %v230_v63 = vrot.slane %v229_v55, 1  ;;  %v244_v0 = vadd.f32 %v243_v56, %v242_v48 }
  0x1f   : > { %v256_v1 = vsel %vm248_vm1, %v201_v58, %v216_v59 }
  0x20   : > { %v252_v2 = vsel %vm251_vm2, %v250_v62, %v238_v60  ;;  %v231_v3 = vadd.f32 %v230_v63, %v229_v55  ;;  %v245_v4 = vrot.slane %v244_v0, 1 }
  0x21   : > { %v253_v5 = vadd.f32 %v252_v2, %v247_v61 }
  0x22   : > { %v246_v6 = vadd.f32 %v245_v4, %v244_v0  ;;  %v257_v8 = vsel %vm186_vm0, %v256_v1, %v231_v3 }
  0x23   : > { %254 = vst [vmem:[%s460_s20] sm:$0xf] %v253_v5 }
  0x24   : > { %v258_v9 = vsel %vm251_vm2, %v257_v8, %v246_v6 }
  0x25   : > { %v259_v10 = vadd.f32 %v258_v9, %v255_v7 }
  0x27   : > { %260 = vst [vmem:[%s466_s23] sm:$0xf] %v259_v10 }
  0x28 PF: > { %s13_s11 = sadd.s32 1, %s418_s11   ;;  %s499_s9 = smov %s414_s10 }
  0x29   : > { %p10_p5 = scmp.ge.s32.totalorder %s13_s11, 4   ;;  %s500_s10 = smov %s502_s12 }
  0x2b   :  { %12 = sbr.rel (!%p10_p5) target bundleno = 2 (0x2), region = 70 }

// kernel: depthwise_separable_conv.4
= control target key start
LH: loop header
LB: loop body
LE: loop exit
PB: predicated region body
PF: predicated region fallthrough
CT: control target
= control target key end

     0   :  { %10 = vsyncpa [#allocation3], 0  ;;  %s1120_s0 = inlined_call_operand.vmem [shape: f32[2,4,2,128], index: 0, kind: input, shape index: {}]   ;;  %s1121_s1 = inlined_call_operand.vmem [shape: f32[2,4], index: 1, kind: input, shape index: {}]   ;;  %s1122_s2 = inlined_call_operand.vmem [shape: f32[8,4], index: 2, kind: input, shape index: {}]   ;;  %s1123_s3 = inlined_call_operand.vmem [shape: f32[2,8,128], index: 3, kind: output, shape index: {0}]   ;;  %s1124_s4 = inlined_call_operand.vmem [shape: f32[2,8,128], index: 4, kind: output, shape index: {1}]  }
   0x1   :  { %11 = vsyncpa [#allocation5], 0  ;;  %s880_s15 = smov 0   ;;  %s882_s16 = smov 0  }
   0x2   :  { %s884_s17 = smov 0  }
   0x3 LB: > { %s691_s18 = sadd.s32 4294967295, %s851_s17   ;;  %s29_s19 = sadd.s32 1, %s847_s16  ;;  %s851_s17 = sphi %s884_s17, %s17_s17   ;;  %s847_s16 = sphi %s882_s16, %s1134_s16   ;;  %s843_s15 = sphi %s880_s15, %s1133_s15  }
   0x4   : > { %p31_p0 = scmp.ge.s32.totalorder %s29_s19, 2  ;;  %p693_p1 = scmp.ge.s32.totalorder %s851_s17, 1 }
   0x5   : > { %p156_p2 = scmp.lt.s32.totalorder %s851_s17, 3  ;;  %p905_p4 = scmp.eq.s32.totalorder %s691_s18, 0 }
   0x6   : > { %s1136_s19 = smov (%p31_p0, %s29_s19), 0  ;;  %s169_s24 = sshll.u32 %s1121_s1, 4  ;;  %s170_s24 = int_to_ptr.vmem [resolvable:$true] %s169_s24 }
   0x7   : > { %p901_p3 = pnand %p693_p1, %p156_p2  ;;  %s180_s27 = sshll.u32 %s1122_s2, 4  ;;  %s181_s27 = int_to_ptr.vmem [resolvable:$true] %s180_s27 }
   0x8   : > { %s1129_s21 = scalar_select %p905_p4, 1, 0 }
   0x9   : > { %s1128_s20 = scalar_select %p901_p3, 1, 0 }
   0xa   : > { %p753_p5 = pneg %p901_p3  ;;  %s791_s29 = scalar_lea.vmem %s170_s24, 32 }
   0xb   : > { %p792_p7 = scmp.ne.s32.totalorder %s170_s24, %s791_s29  ;;  %p799_p11 = scmp.lt.s32.totalorder %s170_s24, %s170_s24 }
   0xc   : > { %p919_p6 = pnand %p905_p4, %p753_p5  ;;  %p800_p12 = scmp.lt.s32.totalorder %s791_s29, %s791_s29 }
   0xe   : > { %p793_p8 = pneg %p919_p6  ;;  %p801_p13 = por %p800_p12, %p799_p11 }
  0x10   : > { %p794_p9 = pnand %p793_p8, %p792_p7 }
  0x12   : > { %p795_p10 = pneg %p794_p9 }
  0x14   : > { %p802_p0 = pnand %p801_p13, %p795_p10 }
  0x16   : > { %805 = shalt.err (!%p802_p0)
}
  0x17   : > { %s853_s30 = smov [#allocation2]   ;;  %s806_s5 = scalar_lea.vmem %s181_s27, 128 }
  0x18   : > { %756 = dma.vmem_to_smem (!%p919_p6), %s170_s24, 32, %s853_s30, [#allocation3]  }
  0x19   : > { %p807_p1 = scmp.ne.s32.totalorder %s181_s27, %s806_s5  ;;  %p814_p4 = scmp.lt.s32.totalorder %s181_s27, %s181_s27 }
  0x1a   : > { %p815_p3 = scmp.lt.s32.totalorder %s806_s5, %s806_s5 }
  0x1b   : > { %p809_p2 = pnand %p807_p1, %p793_p8 }
  0x1c   : > { %p816_p7 = por %p815_p3, %p814_p4 }
  0x1d   : > { %p810_p5 = pneg %p809_p2 }
  0x1f   : > { %p817_p9 = pnand %p816_p7, %p810_p5 }
  0x21   : > { %820 = shalt.err (!%p817_p9)
}
  0x22   : > { %s854_s6 = smov [#allocation4]   ;;  %p1131_p10 = scmp.ne.s32.totalorder %s1128_s20, 0 }
  0x23   : > { %759 = dma.vmem_to_smem (!%p919_p6), %s181_s27, 128, %s854_s6, [#allocation5]  }
  0x24   : > { %204 = sbr.rel (%p1131_p10) target bundleno = 127 (0x7f), region = 32  ;;  %p1132_p11 = scmp.ne.s32.totalorder (!%p1131_p10), %s1129_s21, 0 }
  0x29   : > { %834 = dma.done.wait (%p1132_p11), [#allocation3], 32  }
  0x2a   : > { %836 = vsyncadd (%p1132_p11), [#allocation3], 4294967264 }
  0x2b   : > { %838 = dma.done.wait (%p1132_p11), [#allocation5], 128  }
  0x2c   : > { %840 = vsyncadd (%p1132_p11), [#allocation5], 4294967168 }
  0x2d   : > { %214 = sfence }
  0x2e   : > { %p241_p3 = scmp.lt.s32.totalorder %s843_s15, 1  ;;  %s267_s7 = sld [smem:[#allocation2]]  ;;  %vm318_vm4 = vcmask 1041408   ;;  %vm545_vm5 = vcmask 1040384   ;;  %vm548_vm6 = vcmask 1042432   ;;  %vm550_vm7 = vcmask 1043456  }
  0x2f   : > { %s704_s8 = sld [smem:[#allocation2 + $0x80]]  ;;  %vm552_vm8 = vcmask 1044480   ;;  %vm554_vm9 = vcmask 1045504   ;;  %vm556_vm10 = vcmask 1046528  }
  0x30   : > { %s1138_s15 = smov (!%p241_p3, %s843_s15), 1  ;;  %s705_s9 = sld [smem:[#allocation2 + $0x1]] }
  0x31   : > { %s941_s10 = sshll.u32 %s1138_s15, 3  ;;  %s706_s11 = sld [smem:[#allocation2 + $0x81]] }
  0x32   : > { %s248_s14 = scalar_lea.vmem %s1120_s0, %s941_s10  ;;  %s707_s18 = sld [smem:[#allocation2 + $0x2]] }
  0x33   : > { %v263_v0 = vld [vmem:[%s248_s14] sm:$0x3]  ;;  %v264_v2 = vld [vmem:[%s248_s14 + $0x2] sm:$0x3]  ;;  %s708_s20 = sld [smem:[#allocation2 + $0x82]] }
  0x34   : > { %v268_v1 = vstv %s267_s7  ;;  %s709_s21 = sld [smem:[#allocation2 + $0x3]]  ;;  %v265_v9 = vld [vmem:[%s248_s14 + $0x4] sm:$0x3]  ;;  %v266_v12 = vld [vmem:[%s248_s14 + $0x6] sm:$0x3] }
  0x35   : > { %v269_v3 = vmul.f32 %v268_v1, %v263_v0  ;;  %v271_v4 = vstv %s704_s8  ;;  %s710_s15 = sld [smem:[#allocation2 + $0x83]] }
  0x36   : > { %v277_v6 = vstv %s705_s9  ;;  %s303_s22 = sld [smem:[#allocation4]] }
  0x37   : > { %v272_v5 = vadd.f32 %v271_v4, %v269_v3  ;;  %v278_v7 = vmul.f32 %v277_v6, %v264_v2  ;;  %v280_v8 = vstv %s706_s11  ;;  %s711_s23 = sld [smem:[#allocation4 + $0x1]] }
  0x38   : > { %v286_v13 = vstv %s707_s18  ;;  %s712_s24 = sld [smem:[#allocation4 + $0x2]] }
  0x39   : > { %v274_v10 = vmul.f32 0.1, %v272_v5  ;;  %vm273_vm0 = vcmp.ge.f32.partialorder %v272_v5, 0.0  ;;  %v281_v11 = vadd.f32 %v280_v8, %v278_v7  ;;  %v287_v15 = vmul.f32 %v286_v13, %v265_v9  ;;  %s947_s25 = sld [smem:[#allocation4 + $0x3]] }
  0x3a   : > { %v289_v16 = vstv %s708_s20  ;;  %v295_v18 = vstv %s709_s21  ;;  %s714_s26 = sld [smem:[#allocation4 + $0x80]] }
  0x3b   : > { %vm282_vm1 = vcmp.ge.f32.partialorder %v281_v11, 0.0  ;;  %v283_v14 = vmul.f32 0.1, %v281_v11  ;;  %v949_v17 = vsel %vm273_vm0, %v272_v5, %v274_v10  ;;  %v290_v19 = vadd.f32 %v289_v16, %v287_v15  ;;  %s715_s27 = sld [smem:[#allocation4 + $0x81]] }
  0x3c   : > { %v296_v20 = vmul.f32 %v295_v18, %v266_v12  ;;  %v298_v21 = vstv %s710_s15  ;;  %v304_v23 = vstv %s303_s22  ;;  %s716_s28 = sld [smem:[#allocation4 + $0x82]] }
  0x3d   : > { %v951_v22 = vsel %vm282_vm1, %v281_v11, %v283_v14  ;;  %vm291_vm2 = vcmp.ge.f32.partialorder %v290_v19, 0.0  ;;  %v292_v24 = vmul.f32 0.1, %v290_v19  ;;  %v305_v26 = vmul.f32 %v304_v23, %v949_v17  ;;  %s717_s29 = sld [smem:[#allocation4 + $0x83]] }
  0x3e   : > { %v299_v25 = vadd.f32 %v298_v21, %v296_v20  ;;  %v307_v27 = vstv %s711_s23  ;;  %v311_v28 = vstv %s712_s24  ;;  %s718_s30 = sld [smem:[#allocation4 + $0x100]] }
  0x3f   : > { %v954_v29 = vsel %vm291_vm2, %v290_v19, %v292_v24  ;;  %v308_v31 = vmul.f32 %v307_v27, %v951_v22  ;;  %s719_s5 = sld [smem:[#allocation4 + $0x101]]  ;;  %v315_v33 = vstv %s947_s25 }
  0x40   : > { %vm300_vm3 = vcmp.ge.f32.partialorder %v299_v25, 0.0  ;;  %v301_v30 = vmul.f32 0.1, %v299_v25  ;;  %v312_v32 = vmul.f32 %v311_v28, %v954_v29  ;;  %v335_v34 = vstv %s714_s26  ;;  %s720_s6 = sld [smem:[#allocation4 + $0x102]] }
  0x41   : > { %v309_v36 = vadd.f32 %v308_v31, %v305_v26  ;;  %v336_v37 = vmul.f32 %v335_v34, %v949_v17  ;;  %v338_v38 = vstv %s715_s27  ;;  %s721_s7 = sld [smem:[#allocation4 + $0x103]] }
  0x42   : > { %v959_v35 = vsel %vm300_vm3, %v299_v25, %v301_v30  ;;  %v339_v40 = vmul.f32 %v338_v38, %v951_v22  ;;  %v342_v41 = vstv %s716_s28  ;;  %s964_s8 = sld [smem:[#allocation4 + $0x180]] }
  0x43   : > { %v316_v39 = vmul.f32 %v315_v33, %v959_v35  ;;  %v313_v42 = vadd.f32 %v312_v32, %v309_v36  ;;  %v343_v43 = vmul.f32 %v342_v41, %v954_v29  ;;  %v346_v44 = vstv %s717_s29  ;;  %s967_s9 = sld [smem:[#allocation4 + $0x181]] }
  0x44   : > { %v340_v45 = vadd.f32 %v339_v40, %v336_v37  ;;  %v347_v46 = vmul.f32 %v346_v44, %v959_v35  ;;  %v365_v47 = vstv %s718_s30  ;;  %s970_s11 = sld [smem:[#allocation4 + $0x182]] }
  0x45   : > { %v317_v48 = vadd.f32 %v316_v39, %v313_v42  ;;  %v366_v49 = vmul.f32 %v365_v47, %v949_v17  ;;  %v368_v50 = vstv %s719_s5  ;;  %s974_s12 = sld [smem:[#allocation4 + $0x183]] }
  0x46   : > { %v344_v51 = vadd.f32 %v343_v43, %v340_v45  ;;  %v369_v52 = vmul.f32 %v368_v50, %v951_v22  ;;  %v372_v53 = vstv %s720_s6  ;;  %s985_s13 = sld [smem:[#allocation4 + $0x200]] }
  0x47   : > { %v319_v54 = vsel %vm318_vm4, %v317_v48, 0.0  ;;  %v326_v55 = vmul.f32 %v317_v48, %v317_v48  ;;  %v373_v56 = vmul.f32 %v372_v53, %v954_v29  ;;  %v376_v57 = vstv %s721_s7  ;;  %s991_s14 = sld [smem:[#allocation4 + $0x201]] }
  0x48   : > { %v320_v58 = vrot.slane %v319_v54, 4  ;;  %v348_v59 = vadd.f32 %v347_v46, %v344_v51  ;;  %v370_v60 = vadd.f32 %v369_v52, %v366_v49  ;;  %v377_v62 = vmul.f32 %v376_v57, %v959_v35  ;;  %s994_s18 = sld [smem:[#allocation4 + $0x202]] }
  0x49   : > { %v327_v61 = vsel %vm318_vm4, %v326_v55, 0.0  ;;  %v395_v63 = vstv %s964_s8  ;;  %v398_v0 = vstv %s967_s9  ;;  %s996_s20 = sld [smem:[#allocation4 + $0x203]]  ;;  %s252_s8 = scalar_lea.vmem %s1123_s3, %s941_s10 }
  0x4a   : > { %v321_v1 = vadd.f32 %v320_v58, %v319_v54  ;;  %v328_v2 = vrot.slane %v327_v61, 4  ;;  %v349_v3 = vsel %vm318_vm4, %v348_v59, 0.0  ;;  %v356_v4 = vmul.f32 %v348_v59, %v348_v59  ;;  %s1000_s21 = sld [smem:[#allocation4 + $0x280]] }
  0x4b   : > { %v350_v5 = vrot.slane %v349_v3, 4  ;;  %v374_v6 = vadd.f32 %v373_v56, %v370_v60  ;;  %v396_v7 = vmul.f32 %v395_v63, %v949_v17  ;;  %v399_v8 = vmul.f32 %v398_v0, %v951_v22  ;;  %s1002_s15 = sld [smem:[#allocation4 + $0x281]] }
  0x4c   : > { %v322_v9 = vrot.slane %v321_v1, 2  ;;  %v329_v10 = vadd.f32 %v328_v2, %v327_v61  ;;  %v357_v11 = vsel %vm318_vm4, %v356_v4, 0.0  ;;  %v402_v12 = vstv %s970_s11  ;;  %s1005_s22 = sld [smem:[#allocation4 + $0x282]] }
  0x4d   : > { %v351_v13 = vadd.f32 %v350_v5, %v349_v3  ;;  %v358_v14 = vrot.slane %v357_v11, 4  ;;  %v378_v15 = vadd.f32 %v377_v62, %v374_v6  ;;  %v400_v16 = vadd.f32 %v399_v8, %v396_v7  ;;  %s1007_s23 = sld [smem:[#allocation4 + $0x283]] }
  0x4e   : > { %v323_v18 = vadd.f32 %v322_v9, %v321_v1  ;;  %v330_v19 = vrot.slane %v329_v10, 2  ;;  %v403_v20 = vmul.f32 %v402_v12, %v954_v29  ;;  %v406_v21 = vstv %s974_s12  ;;  %s1013_s24 = sld [smem:[#allocation4 + $0x300]]  ;;  %s256_s12 = scalar_lea.vmem %s1124_s4, %s941_s10 }
  0x4f   : > { %v352_v23 = vrot.slane %v351_v13, 2  ;;  %v359_v24 = vadd.f32 %v358_v14, %v357_v11  ;;  %v379_v25 = vsel %vm318_vm4, %v378_v15, 0.0  ;;  %v386_v26 = vmul.f32 %v378_v15, %v378_v15  ;;  %s1021_s25 = sld [smem:[#allocation4 + $0x301]] }
  0x50   : > { %v324_v27 = vrot.slane %v323_v18, 1  ;;  %v331_v28 = vadd.f32 %v330_v19, %v329_v10  ;;  %v380_v30 = vrot.slane %v379_v25, 4  ;;  %v404_v31 = vadd.f32 %v403_v20, %v400_v16  ;;  %s1025_s26 = sld [smem:[#allocation4 + $0x302]] }
  0x51   : > { %v353_v32 = vadd.f32 %v352_v23, %v351_v13  ;;  %v360_v33 = vrot.slane %v359_v24, 2  ;;  %v387_v34 = vsel %vm318_vm4, %v386_v26, 0.0  ;;  %v407_v36 = vmul.f32 %v406_v21, %v959_v35  ;;  %s1030_s27 = sld [smem:[#allocation4 + $0x303]] }
  0x52   : > { %v381_v37 = vadd.f32 %v380_v30, %v379_v25  ;;  %v388_v38 = vrot.slane %v387_v34, 4  ;;  %v332_v39 = vrot.slane %v331_v28, 1  ;;  %v425_v41 = vstv %s985_s13  ;;  %s1037_s28 = sld [smem:[#allocation4 + $0x380]] }
  0x53   : > { %v408_v40 = vadd.f32 %v407_v36, %v404_v31  ;;  %v354_v42 = vrot.slane %v353_v32, 1  ;;  %v361_v43 = vadd.f32 %v360_v33, %v359_v24  ;;  %v1009_v46 = vadd.f32 %v324_v27, %v323_v18  ;;  %s1045_s29 = sld [smem:[#allocation4 + $0x381]] }
  0x54   : > { %v382_v44 = vrot.slane %v381_v37, 2  ;;  %v389_v45 = vadd.f32 %v388_v38, %v387_v34  ;;  %v426_v49 = vmul.f32 %v425_v41, %v949_v17  ;;  %v428_v53 = vstv %s991_s14  ;;  %s1053_s30 = sld [smem:[#allocation4 + $0x382]] }
  0x55   : > { %v409_v47 = vsel %vm318_vm4, %v408_v40, 0.0  ;;  %v416_v48 = vmul.f32 %v408_v40, %v408_v40  ;;  %v1016_v54 = vadd.f32 %v332_v39, %v331_v28  ;;  %v429_v56 = vmul.f32 %v428_v53, %v951_v22  ;;  %s1062_s5 = sld [smem:[#allocation4 + $0x383]] }
  0x56   : > { %v383_v50 = vadd.f32 %v382_v44, %v381_v37  ;;  %v390_v51 = vrot.slane %v389_v45, 2  ;;  %v410_v52 = vrot.slane %v409_v47, 4  ;;  %v432_v57 = vstv %s994_s18 }
  0x57   : > { %v417_v55 = vsel %vm318_vm4, %v416_v48, 0.0  ;;  %v1023_v58 = vadd.f32 %v354_v42, %v353_v32  ;;  %v362_v59 = vrot.slane %v361_v43, 1  ;;  %v430_v62 = vadd.f32 %v429_v56, %v426_v49 }
  0x58   : > { %v411_v60 = vadd.f32 %v410_v52, %v409_v47  ;;  %v418_v61 = vrot.slane %v417_v55, 4  ;;  %v433_v63 = vmul.f32 %v432_v57, %v954_v29  ;;  %v436_v0 = vstv %s996_s20 }
  0x59   : > { %v455_v1 = vstv %s1000_s21  ;;  %v384_v2 = vrot.slane %v383_v50, 1  ;;  %v1032_v3 = vadd.f32 %v390_v51, %v389_v45  ;;  %v437_v7 = vmul.f32 %v436_v0, %v959_v35 }
  0x5a   : > { %v412_v4 = vrot.slane %v411_v60, 2  ;;  %v419_v5 = vadd.f32 %v418_v61, %v417_v55  ;;  %v434_v6 = vadd.f32 %v433_v63, %v430_v62  ;;  %v456_v8 = vmul.f32 %v455_v1, %v949_v17 }
  0x5b   : > { %v458_v9 = vstv %s1002_s15  ;;  %v1039_v10 = vadd.f32 %v362_v59, %v361_v43  ;;  %v462_v15 = vstv %s1005_s22  ;;  %v466_v16 = vstv %s1007_s23 }
  0x5c   : > { %v413_v11 = vadd.f32 %v412_v4, %v411_v60  ;;  %v420_v12 = vrot.slane %v419_v5, 2  ;;  %v459_v13 = vmul.f32 %v458_v9, %v951_v22  ;;  %v438_v14 = vadd.f32 %v437_v7, %v434_v6 }
  0x5d   : > { %v485_v18 = vstv %s1013_s24  ;;  %v1047_v19 = vadd.f32 %v384_v2, %v383_v50  ;;  %v463_v23 = vmul.f32 %v462_v15, %v954_v29  ;;  %v392_v24 = vrot.slane %v1032_v3, 1 }
  0x5e   : > { %v414_v20 = vrot.slane %v413_v11, 1  ;;  %v460_v21 = vadd.f32 %v459_v13, %v456_v8  ;;  %v439_v25 = vsel %vm318_vm4, %v438_v14, 0.0  ;;  %v446_v26 = vmul.f32 %v438_v14, %v438_v14 }
  0x5f   : > { %v467_v27 = vmul.f32 %v466_v16, %v959_v35  ;;  %v1055_v28 = vadd.f32 %v420_v12, %v419_v5  ;;  %v440_v30 = vrot.slane %v439_v25, 4  ;;  %v486_v32 = vmul.f32 %v485_v18, %v949_v17 }
  0x60   : > { %v464_v31 = vadd.f32 %v463_v23, %v460_v21  ;;  %v447_v33 = vsel %vm318_vm4, %v446_v26, 0.0  ;;  %v488_v34 = vstv %s1021_s25  ;;  %v492_v36 = vstv %s1025_s26 }
  0x61   : > { %v496_v37 = vstv %s1030_s27  ;;  %v415_v38 = vadd.f32 %v414_v20, %v413_v11  ;;  %v441_v39 = vadd.f32 %v440_v30, %v439_v25  ;;  %v448_v40 = vrot.slane %v447_v33, 4 }
  0x62   : > { %v468_v41 = vadd.f32 %v467_v27, %v464_v31  ;;  %v489_v42 = vmul.f32 %v488_v34, %v951_v22  ;;  %v493_v43 = vmul.f32 %v492_v36, %v954_v29  ;;  %v497_v44 = vmul.f32 %v496_v37, %v959_v35 }
  0x63   : > { %v515_v45 = vstv %s1037_s28  ;;  %v442_v47 = vrot.slane %v441_v39, 2  ;;  %v449_v48 = vadd.f32 %v448_v40, %v447_v33  ;;  %v518_v55 = vstv %s1045_s29 }
  0x64   : > { %v469_v49 = vsel %vm318_vm4, %v468_v41, 0.0  ;;  %v476_v50 = vmul.f32 %v468_v41, %v468_v41  ;;  %v490_v52 = vadd.f32 %v489_v42, %v486_v32  ;;  %v516_v53 = vmul.f32 %v515_v45, %v949_v17 }
  0x65   : > { %v470_v51 = vrot.slane %v469_v49, 4  ;;  %v443_v56 = vadd.f32 %v442_v47, %v441_v39  ;;  %v450_v57 = vrot.slane %v449_v48, 2  ;;  %v519_v60 = vmul.f32 %v518_v55, %v951_v22 }
  0x66   : > { %v477_v59 = vsel %vm318_vm4, %v476_v50, 0.0  ;;  %v494_v63 = vadd.f32 %v493_v43, %v490_v52  ;;  %v522_v0 = vstv %s1053_s30  ;;  %v526_v8 = vstv %s1062_s5 }
  0x67   : > { %v471_v61 = vadd.f32 %v470_v51, %v469_v49  ;;  %v478_v62 = vrot.slane %v477_v59, 4  ;;  %v444_v1 = vrot.slane %v443_v56, 1  ;;  %v451_v2 = vadd.f32 %v450_v57, %v449_v48 }
  0x68   : > { %v520_v4 = vadd.f32 %v519_v60, %v516_v53  ;;  %v523_v5 = vmul.f32 %v522_v0, %v954_v29  ;;  %v498_v7 = vadd.f32 %v497_v44, %v494_v63  ;;  %v422_v9 = vrot.slane %v1055_v28, 1 }
  0x69   : > { %v472_v6 = vrot.slane %v471_v61, 2  ;;  %v479_v17 = vadd.f32 %v478_v62, %v477_v59  ;;  %v445_v11 = vadd.f32 %v444_v1, %v443_v56  ;;  %v527_v22 = vmul.f32 %v526_v8, %v959_v35 }
  0x6a   : > { %v524_v12 = vadd.f32 %v523_v5, %v520_v4  ;;  %v499_v15 = vsel %vm318_vm4, %v498_v7, 0.0  ;;  %v506_v16 = vmul.f32 %v498_v7, %v498_v7  ;;  %v452_v18 = vrot.slane %v451_v2, 1 }
  0x6b   : > { %v473_v13 = vadd.f32 %v472_v6, %v471_v61  ;;  %v480_v14 = vrot.slane %v479_v17, 2  ;;  %v500_v20 = vrot.slane %v499_v15, 4  ;;  %v546_v29 = vsel %vm545_vm5, %v1009_v46, %v1023_v58 }
  0x6c   : > { %v528_v21 = vadd.f32 %v527_v22, %v524_v12  ;;  %v507_v26 = vsel %vm318_vm4, %v506_v16, 0.0  ;;  %v547_v35 = vsel %vm318_vm4, %v546_v29, %v1047_v19  ;;  %v393_v33 = vadd.f32 %v392_v24, %v1032_v3 }
  0x6d   : > { %v474_v23 = vrot.slane %v473_v13, 1  ;;  %v481_v25 = vadd.f32 %v480_v14, %v479_v17  ;;  %v501_v27 = vadd.f32 %v500_v20, %v499_v15  ;;  %v508_v30 = vrot.slane %v507_v26, 4 }
  0x6e   : > { %v529_v31 = vsel %vm318_vm4, %v528_v21, 0.0  ;;  %v536_v32 = vmul.f32 %v528_v21, %v528_v21  ;;  %v549_v46 = vsel %vm548_vm6, %v547_v35, %v415_v38  ;;  %v423_v58 = vadd.f32 %v422_v9, %v1055_v28 }
  0x6f   : > { %v482_v34 = vrot.slane %v481_v25, 1  ;;  %v530_v36 = vrot.slane %v529_v31, 4  ;;  %v502_v37 = vrot.slane %v501_v27, 2  ;;  %v509_v39 = vadd.f32 %v508_v30, %v507_v26 }
  0x70   : > { %v537_v40 = vsel %vm318_vm4, %v536_v32, 0.0  ;;  %v453_v19 = vadd.f32 %v452_v18, %v451_v2  ;;  %v475_v41 = vadd.f32 %v474_v23, %v473_v13  ;;  %v551_v47 = vsel %vm550_vm7, %v549_v46, %v445_v11 }
  0x71   : > { %v531_v42 = vadd.f32 %v530_v36, %v529_v31  ;;  %v538_v43 = vrot.slane %v537_v40, 4  ;;  %v503_v44 = vadd.f32 %v502_v37, %v501_v27  ;;  %v510_v45 = vrot.slane %v509_v39, 2 }
  0x72   : > { %v561_v3 = vsel %vm545_vm5, %v1016_v54, %v1039_v10  ;;  %v483_v24 = vadd.f32 %v482_v34, %v481_v25  ;;  %v553_v55 = vsel %vm552_vm8, %v551_v47, %v475_v41 }
  0x73   : > { %v532_v38 = vrot.slane %v531_v42, 2  ;;  %v539_v48 = vadd.f32 %v538_v43, %v537_v40  ;;  %v562_v28 = vsel %vm318_vm4, %v561_v3, %v393_v33  ;;  %v504_v49 = vrot.slane %v503_v44, 1 }
  0x74   : > { %v511_v50 = vadd.f32 %v510_v45, %v509_v39  ;;  %v563_v51 = vsel %vm548_vm6, %v562_v28, %v423_v58 }
  0x75   : > { %v533_v52 = vadd.f32 %v532_v38, %v531_v42  ;;  %v540_v53 = vrot.slane %v539_v48, 2  ;;  %v564_v56 = vsel %vm550_vm7, %v563_v51, %v453_v19  ;;  %v505_v57 = vadd.f32 %v504_v49, %v503_v44 }
  0x76   : > { %v512_v54 = vrot.slane %v511_v50, 1  ;;  %v565_v60 = vsel %vm552_vm8, %v564_v56, %v483_v24 }
  0x77   : > { %v534_v10 = vrot.slane %v533_v52, 1  ;;  %v541_v59 = vadd.f32 %v540_v53, %v539_v48  ;;  %v555_v62 = vsel %vm554_vm9, %v553_v55, %v505_v57 }
  0x78   : > { %v513_v61 = vadd.f32 %v512_v54, %v511_v50 }
  0x79   : > { %v535_v63 = vadd.f32 %v534_v10, %v533_v52  ;;  %v542_v0 = vrot.slane %v541_v59, 1 }
  0x7a   : > { %v566_v1 = vsel %vm554_vm9, %v565_v60, %v513_v61 }
  0x7b   : > { %v543_v2 = vadd.f32 %v542_v0, %v541_v59  ;;  %v557_v4 = vsel %vm556_vm10, %v555_v62, %v535_v63 }
  0x7c   : > { %559 = vst [vmem:[%s252_s8] sm:$0xff] %v557_v4 }
  0x7d   : > { %v567_v5 = vsel %vm556_vm10, %v566_v1, %v543_v2 }
  0x7e   : > { %569 = vst [vmem:[%s256_s12] sm:$0xff] %v567_v5 }
  0x7f PF: > { %s17_s17 = sadd.s32 1, %s851_s17   ;;  %s1133_s15 = smov %s847_s16 }
  0x80   : > { %p14_p4 = scmp.ge.s32.totalorder %s17_s17, 4   ;;  %s1134_s16 = smov %s1136_s19 }
  0x82   :  { %16 = sbr.rel (!%p14_p4) target bundleno = 3 (0x3), region = 87 }
  0x87   :  { %603 = vsyncpa [#allocation3], 1 }
  0x88   :  { %605 = vsyncpa [#allocation3 + $0x1], 1 }
  0x89   :  { %606 = vsyncpa [#allocation5], 1 }

// kernel: depthwise_separable_conv.5
= control target key start
LH: loop header
LB: loop body
LE: loop exit
PB: predicated region body
PF: predicated region fallthrough
CT: control target
= control target key end

     0   :  { %9 = vsyncpa [#allocation3], 0  ;;  %s1091_s0 = inlined_call_operand.vmem [shape: f32[2,4,2,128], index: 0, kind: input, shape index: {}]   ;;  %s1092_s1 = inlined_call_operand.vmem [shape: f32[2,4], index: 1, kind: input, shape index: {}]   ;;  %s1093_s2 = inlined_call_operand.vmem [shape: f32[8,4], index: 2, kind: input, shape index: {}]   ;;  %s1094_s3 = inlined_call_operand.vmem [shape: f32[2,8], index: 3, kind: input, shape index: {}]   ;;  %s1095_s4 = inlined_call_operand.vmem [shape: f32[2,8,2,128], index: 4, kind: output, shape index: {}]  }
   0x1   :  { %10 = vsyncpa [#allocation5], 0  ;;  %s869_s15 = smov 0   ;;  %s871_s16 = smov 0  }
   0x2   :  { %s873_s17 = smov 0  }
   0x3 LB: > { %s176_s20 = sshll.u32 %s1093_s2, 4  ;;  %s630_s21 = sadd.s32 4294967295, %s839_s17   ;;  %s839_s17 = sphi %s873_s17, %s16_s17   ;;  %s835_s16 = sphi %s871_s16, %s1106_s16   ;;  %s831_s15 = sphi %s869_s15, %s1105_s15   ;;  %s177_s20 = int_to_ptr.vmem [resolvable:$true] %s176_s20 }
   0x4   : > { %p632_p0 = scmp.ge.s32.totalorder %s839_s17, 1  ;;  %p152_p1 = scmp.lt.s32.totalorder %s839_s17, 3 }
   0x5   : > { %p890_p2 = scmp.eq.s32.totalorder %s630_s21, 0  ;;  %s28_s24 = sadd.s32 1, %s835_s16 }
   0x6   : > { %p894_p3 = pnand %p632_p0, %p152_p1  ;;  %s165_s27 = sshll.u32 %s1092_s1, 4  ;;  %s166_s27 = int_to_ptr.vmem [resolvable:$true] %s165_s27 }
   0x7   : > { %s1099_s22 = scalar_select %p890_p2, 1, 0 }
   0x8   : > { %s1100_s23 = scalar_select %p894_p3, 1, 0 }
   0x9   : > { %p721_p4 = pneg %p894_p3  ;;  %p910_p6 = scmp.ge.s32.totalorder %s28_s24, 2 }
   0xa   : > { %s187_s6 = sshll.u32 %s1094_s3, 4  ;;  %s764_s7 = scalar_lea.vmem %s177_s20, 128  ;;  %s188_s6 = int_to_ptr.vmem [resolvable:$true] %s187_s6 }
   0xb   : > { %p906_p5 = pnand %p890_p2, %p721_p4  ;;  %p765_p7 = scmp.ne.s32.totalorder %s177_s20, %s764_s7 }
   0xc   : > { %p772_p11 = scmp.lt.s32.totalorder %s177_s20, %s177_s20  ;;  %p773_p12 = scmp.lt.s32.totalorder %s764_s7, %s764_s7 }
   0xd   : > { %p766_p8 = pneg %p906_p5 }
   0xe   : > { %p774_p13 = por %p773_p12, %p772_p11 }
   0xf   : > { %p767_p9 = pnand %p766_p8, %p765_p7 }
  0x11   : > { %p768_p10 = pneg %p767_p9 }
  0x13   : > { %p775_p0 = pnand %p774_p13, %p768_p10 }
  0x15   : > { %778 = shalt.err (!%p775_p0)
}
  0x16   : > { %s841_s8 = smov [#allocation4]   ;;  %s1108_s24 = smov (%p910_p6, %s28_s24), 0 }
  0x17   : > { %727 = dma.vmem_to_smem (!%p906_p5), %s177_s20, 128, %s841_s8, [#allocation5]  }
  0x18   : > { %s779_s9 = scalar_lea.vmem %s166_s27, 32  ;;  %p787_p9 = scmp.lt.s32.totalorder %s166_s27, %s166_s27 }
  0x19   : > { %p780_p1 = scmp.ne.s32.totalorder %s166_s27, %s779_s9  ;;  %p788_p2 = scmp.lt.s32.totalorder %s779_s9, %s779_s9 }
  0x1b   : > { %p782_p4 = pnand %p780_p1, %p766_p8  ;;  %p789_p11 = por %p788_p2, %p787_p9 }
  0x1d   : > { %p783_p7 = pneg %p782_p4 }
  0x1f   : > { %p790_p10 = pnand %p789_p11, %p783_p7 }
  0x21   : > { %793 = shalt.err (!%p790_p10)
}
  0x22   : > { %s842_s10 = smov [#allocation2]   ;;  %s794_s11 = scalar_lea.vmem %s188_s6, 32 }
  0x23   : > { %724 = dma.vmem_to_smem (!%p906_p5), %s166_s27, 32, %s842_s10, [#allocation3]  }
  0x24   : > { %p795_p6 = scmp.ne.s32.totalorder %s188_s6, %s794_s11  ;;  %p802_p0 = scmp.lt.s32.totalorder %s188_s6, %s188_s6 }
  0x25   : > { %p803_p1 = scmp.lt.s32.totalorder %s794_s11, %s794_s11 }
  0x26   : > { %p797_p12 = pnand %p795_p6, %p766_p8 }
  0x27   : > { %p804_p4 = por %p803_p1, %p802_p0 }
  0x28   : > { %p798_p13 = pneg %p797_p12 }
  0x2a   : > { %p805_p3 = pnand %p804_p4, %p798_p13 }
  0x2c   : > { %808 = shalt.err (!%p805_p3)
}
  0x2d   : > { %s843_s12 = smov [#allocation6]   ;;  %p1103_p2 = scmp.ne.s32.totalorder %s1100_s23, 0 }
  0x2e   : > { %730 = dma.vmem_to_smem (!%p906_p5), %s188_s6, 32, %s843_s12, [#allocation5]  }
  0x2f   : > { %211 = sbr.rel (%p1103_p2) target bundleno = 131 (0x83), region = 36  ;;  %p1104_p7 = scmp.ne.s32.totalorder (!%p1103_p2), %s1099_s22, 0 }
  0x34   : > { %822 = dma.done.wait (%p1104_p7), [#allocation3], 32  }
  0x35   : > { %824 = vsyncadd (%p1104_p7), [#allocation3], 4294967264 }
  0x36   : > { %826 = dma.done.wait (%p1104_p7), [#allocation5], 160  }
  0x37   : > { %828 = vsyncadd (%p1104_p7), [#allocation5], 4294967136 }
  0x38   : > { %225 = sfence }
  0x39   : > { %p252_p3 = scmp.lt.s32.totalorder %s831_s15, 1  ;;  %s272_s13 = sld [smem:[#allocation2]] }
  0x3a   : > { %s645_s14 = sld [smem:[#allocation2 + $0x80]] }
  0x3b   : > { %s1110_s15 = smov (!%p252_p3, %s831_s15), 1  ;;  %s646_s18 = sld [smem:[#allocation2 + $0x1]] }
  0x3c   : > { %s707_s19 = sshll.u32 %s1110_s15, 3  ;;  %s647_s22 = sld [smem:[#allocation2 + $0x81]] }
  0x3d   : > { %s259_s23 = scalar_lea.vmem %s1091_s0, %s707_s19  ;;  %s648_s25 = sld [smem:[#allocation2 + $0x2]] }
  0x3e   : > { %v268_v0 = vld [vmem:[%s259_s23] sm:$0x3]  ;;  %v269_v2 = vld [vmem:[%s259_s23 + $0x2] sm:$0x3]  ;;  %s649_s26 = sld [smem:[#allocation2 + $0x82]] }
  0x3f   : > { %v273_v1 = vstv %s272_s13  ;;  %s650_s27 = sld [smem:[#allocation2 + $0x3]]  ;;  %v270_v8 = vld [vmem:[%s259_s23 + $0x4] sm:$0x3]  ;;  %v271_v11 = vld [vmem:[%s259_s23 + $0x6] sm:$0x3] }
  0x40   : > { %v274_v3 = vmul.f32 %v273_v1, %v268_v0  ;;  %v276_v4 = vstv %s645_s14  ;;  %s651_s28 = sld [smem:[#allocation2 + $0x83]] }
  0x41   : > { %v282_v6 = vstv %s646_s18  ;;  %s308_s29 = sld [smem:[#allocation4]] }
  0x42   : > { %v277_v5 = vadd.f32 %v276_v4, %v274_v3  ;;  %v283_v7 = vmul.f32 %v282_v6, %v269_v2  ;;  %v285_v10 = vstv %s647_s22  ;;  %s956_s30 = sld [smem:[#allocation4 + $0x1]] }
  0x43   : > { %v291_v13 = vstv %s648_s25  ;;  %s653_s5 = sld [smem:[#allocation4 + $0x2]]  ;;  %s708_s25 = sshll.u32 %s1110_s15, 4 }
  0x44   : > { %v279_v9 = vmul.f32 0.1, %v277_v5  ;;  %vm278_vm0 = vcmp.ge.f32.partialorder %v277_v5, 0.0  ;;  %v286_v12 = vadd.f32 %v285_v10, %v283_v7  ;;  %v292_v14 = vmul.f32 %v291_v13, %v270_v8  ;;  %s958_s6 = sld [smem:[#allocation4 + $0x3]]  ;;  %s1002_s15 = scalar_lea.vmem %s1095_s4, %s708_s25 }
  0x45   : > { %v294_v15 = vstv %s649_s26  ;;  %v300_v18 = vstv %s650_s27  ;;  %s962_s7 = sld [smem:[#allocation6]] }
  0x46   : > { %v960_v16 = vsel %vm278_vm0, %v277_v5, %v279_v9  ;;  %vm287_vm1 = vcmp.ge.f32.partialorder %v286_v12, 0.0  ;;  %v288_v17 = vmul.f32 0.1, %v286_v12  ;;  %v295_v19 = vadd.f32 %v294_v15, %v292_v14  ;;  %s964_s8 = sld [smem:[#allocation6 + $0x80]] }
  0x47   : > { %v301_v20 = vmul.f32 %v300_v18, %v271_v11  ;;  %v303_v21 = vstv %s651_s28  ;;  %v309_v23 = vstv %s308_s29  ;;  %s656_s9 = sld [smem:[#allocation4 + $0x80]] }
  0x48   : > { %v966_v22 = vsel %vm287_vm1, %v286_v12, %v288_v17  ;;  %vm296_vm2 = vcmp.ge.f32.partialorder %v295_v19, 0.0  ;;  %v297_v24 = vmul.f32 0.1, %v295_v19  ;;  %v310_v26 = vmul.f32 %v309_v23, %v960_v16  ;;  %s657_s10 = sld [smem:[#allocation4 + $0x81]] }
  0x49   : > { %v304_v25 = vadd.f32 %v303_v21, %v301_v20  ;;  %v312_v27 = vstv %s956_s30  ;;  %v316_v28 = vstv %s653_s5  ;;  %s658_s11 = sld [smem:[#allocation4 + $0x82]] }
  0x4a   : > { %v970_v29 = vsel %vm296_vm2, %v295_v19, %v297_v24  ;;  %v313_v31 = vmul.f32 %v312_v27, %v966_v22  ;;  %s659_s12 = sld [smem:[#allocation4 + $0x83]]  ;;  %v320_v33 = vstv %s958_s6 }
  0x4b   : > { %vm305_vm3 = vcmp.ge.f32.partialorder %v304_v25, 0.0  ;;  %v306_v30 = vmul.f32 0.1, %v304_v25  ;;  %v317_v32 = vmul.f32 %v316_v28, %v970_v29  ;;  %s975_s13 = sld [smem:[#allocation6 + $0x1]]  ;;  %v324_v41 = vstv %s962_s7 }
  0x4c   : > { %v314_v35 = vadd.f32 %v313_v31, %v310_v26  ;;  %s979_s14 = sld [smem:[#allocation6 + $0x81]]  ;;  %v327_v47 = vstv %s964_s8 }
  0x4d   : > { %v977_v34 = vsel %vm305_vm3, %v304_v25, %v306_v30  ;;  %v334_v37 = vstv %s656_s9  ;;  %s663_s18 = sld [smem:[#allocation4 + $0x100]] }
  0x4e   : > { %v321_v36 = vmul.f32 %v320_v33, %v977_v34  ;;  %v318_v38 = vadd.f32 %v317_v32, %v314_v35  ;;  %v335_v39 = vmul.f32 %v334_v37, %v960_v16  ;;  %v337_v40 = vstv %s657_s10  ;;  %s664_s19 = sld [smem:[#allocation4 + $0x101]] }
  0x4f   : > { %v338_v42 = vmul.f32 %v337_v40, %v966_v22  ;;  %v341_v43 = vstv %s658_s11  ;;  %s665_s20 = sld [smem:[#allocation4 + $0x102]] }
  0x50   : > { %v322_v44 = vadd.f32 %v321_v36, %v318_v38  ;;  %v342_v45 = vmul.f32 %v341_v43, %v970_v29  ;;  %v345_v46 = vstv %s659_s12  ;;  %s666_s21 = sld [smem:[#allocation4 + $0x103]] }
  0x51   : > { %v339_v48 = vadd.f32 %v338_v42, %v335_v39  ;;  %v346_v49 = vmul.f32 %v345_v46, %v977_v34  ;;  %s988_s23 = sld [smem:[#allocation6 + $0x2]]  ;;  %v349_v54 = vstv %s975_s13 }
  0x52   : > { %v325_v50 = vmul.f32 %v324_v41, %v322_v44  ;;  %s990_s22 = sld [smem:[#allocation6 + $0x82]]  ;;  %v352_v58 = vstv %s979_s14 }
  0x53   : > { %v343_v51 = vadd.f32 %v342_v45, %v339_v48  ;;  %v360_v52 = vstv %s663_s18  ;;  %s670_s26 = sld [smem:[#allocation4 + $0x180]] }
  0x54   : > { %v328_v53 = vadd.f32 %v327_v47, %v325_v50  ;;  %v361_v55 = vmul.f32 %v360_v52, %v960_v16  ;;  %v363_v56 = vstv %s664_s19  ;;  %s671_s27 = sld [smem:[#allocation4 + $0x181]] }
  0x55   : > { %v347_v57 = vadd.f32 %v346_v49, %v343_v51  ;;  %v364_v59 = vmul.f32 %v363_v56, %v966_v22  ;;  %v367_v60 = vstv %s665_s20  ;;  %s997_s28 = sld [smem:[#allocation4 + $0x182]] }
  0x56   : > { %vm329_vm4 = vcmp.ge.f32.partialorder %v328_v53, 0.0  ;;  %v330_v61 = vmul.f32 0.1, %v328_v53  ;;  %v368_v62 = vmul.f32 %v367_v60, %v970_v29  ;;  %v371_v63 = vstv %s666_s21  ;;  %s1005_s5 = sld [smem:[#allocation4 + $0x183]] }
  0x57   : > { %v350_v0 = vmul.f32 %v349_v54, %v347_v57  ;;  %v365_v1 = vadd.f32 %v364_v59, %v361_v55  ;;  %v372_v2 = vmul.f32 %v371_v63, %v977_v34  ;;  %s1008_s6 = sld [smem:[#allocation6 + $0x3]]  ;;  %v375_v7 = vstv %s988_s23 }
  0x58   : > { %v331_v3 = vsel %vm329_vm4, %v328_v53, %v330_v61  ;;  %s1010_s7 = sld [smem:[#allocation6 + $0x83]]  ;;  %v378_v13 = vstv %s990_s22 }
  0x59   : > { %332 = vst [vmem:[%s1002_s15] sm:$0x3] %v331_v3  ;;  %v353_v4 = vadd.f32 %v352_v58, %v350_v0  ;;  %v369_v5 = vadd.f32 %v368_v62, %v365_v1  ;;  %v386_v6 = vstv %s670_s26  ;;  %s677_s8 = sld [smem:[#allocation4 + $0x200]] }
  0x5a   : > { %v387_v8 = vmul.f32 %v386_v6, %v960_v16  ;;  %v389_v9 = vstv %s671_s27  ;;  %s678_s9 = sld [smem:[#allocation4 + $0x201]] }
  0x5b   : > { %vm354_vm5 = vcmp.ge.f32.partialorder %v353_v4, 0.0  ;;  %v355_v10 = vmul.f32 0.1, %v353_v4  ;;  %v373_v11 = vadd.f32 %v372_v2, %v369_v5  ;;  %v390_v12 = vmul.f32 %v389_v9, %v966_v22  ;;  %s1016_s10 = sld [smem:[#allocation4 + $0x202]] }
  0x5c   : > { %v393_v14 = vstv %s997_s28  ;;  %v397_v15 = vstv %s1005_s5  ;;  %s1021_s11 = sld [smem:[#allocation4 + $0x203]] }
  0x5d   : > { %v356_v17 = vsel %vm354_vm5, %v353_v4, %v355_v10  ;;  %v376_v18 = vmul.f32 %v375_v7, %v373_v11  ;;  %v391_v19 = vadd.f32 %v390_v12, %v387_v8  ;;  %v394_v20 = vmul.f32 %v393_v14, %v970_v29  ;;  %s1024_s12 = sld [smem:[#allocation6 + $0x4]] }
  0x5e   : > { %662 = vst [vmem:[%s1002_s15 + $0x2] sm:$0x3] %v356_v17  ;;  %v398_v21 = vmul.f32 %v397_v15, %v977_v34  ;;  %s1028_s13 = sld [smem:[#allocation6 + $0x84]]  ;;  %v401_v26 = vstv %s1008_s6  ;;  %v404_v33 = vstv %s1010_s7 }
  0x5f   : > { %v379_v23 = vadd.f32 %v378_v13, %v376_v18  ;;  %v395_v24 = vadd.f32 %v394_v20, %v391_v19  ;;  %v412_v25 = vstv %s677_s8  ;;  %s684_s14 = sld [smem:[#allocation4 + $0x280]] }
  0x60   : > { %v413_v27 = vmul.f32 %v412_v25, %v960_v16  ;;  %v415_v28 = vstv %s678_s9  ;;  %s685_s18 = sld [smem:[#allocation4 + $0x281]] }
  0x61   : > { %vm380_vm6 = vcmp.ge.f32.partialorder %v379_v23, 0.0  ;;  %v381_v30 = vmul.f32 0.1, %v379_v23  ;;  %v399_v31 = vadd.f32 %v398_v21, %v395_v24  ;;  %v416_v32 = vmul.f32 %v415_v28, %v966_v22  ;;  %s1033_s19 = sld [smem:[#allocation4 + $0x282]] }
  0x62   : > { %v419_v35 = vstv %s1016_s10  ;;  %v423_v36 = vstv %s1021_s11  ;;  %s1038_s20 = sld [smem:[#allocation4 + $0x283]] }
  0x63   : > { %v382_v37 = vsel %vm380_vm6, %v379_v23, %v381_v30  ;;  %v402_v38 = vmul.f32 %v401_v26, %v399_v31  ;;  %v417_v39 = vadd.f32 %v416_v32, %v413_v27  ;;  %v420_v40 = vmul.f32 %v419_v35, %v970_v29  ;;  %s1041_s21 = sld [smem:[#allocation6 + $0x5]] }
  0x64   : > { %669 = vst [vmem:[%s1002_s15 + $0x4] sm:$0x3] %v382_v37  ;;  %v424_v41 = vmul.f32 %v423_v36, %v977_v34  ;;  %s1045_s23 = sld [smem:[#allocation6 + $0x85]]  ;;  %v427_v45 = vstv %s1024_s12  ;;  %v430_v51 = vstv %s1028_s13 }
  0x65   : > { %v405_v42 = vadd.f32 %v404_v33, %v402_v38  ;;  %v421_v43 = vadd.f32 %v420_v40, %v417_v39  ;;  %v438_v44 = vstv %s684_s14  ;;  %s691_s22 = sld [smem:[#allocation4 + $0x300]] }
  0x66   : > { %v439_v46 = vmul.f32 %v438_v44, %v960_v16  ;;  %v441_v47 = vstv %s685_s18  ;;  %s692_s25 = sld [smem:[#allocation4 + $0x301]] }
  0x67   : > { %vm406_vm7 = vcmp.ge.f32.partialorder %v405_v42, 0.0  ;;  %v407_v48 = vmul.f32 0.1, %v405_v42  ;;  %v425_v49 = vadd.f32 %v424_v41, %v421_v43  ;;  %v442_v50 = vmul.f32 %v441_v47, %v966_v22  ;;  %s1050_s26 = sld [smem:[#allocation4 + $0x302]] }
  0x68   : > { %v445_v52 = vstv %s1033_s19  ;;  %v449_v53 = vstv %s1038_s20  ;;  %s1055_s27 = sld [smem:[#allocation4 + $0x303]] }
  0x69   : > { %v408_v54 = vsel %vm406_vm7, %v405_v42, %v407_v48  ;;  %v428_v55 = vmul.f32 %v427_v45, %v425_v49  ;;  %v443_v56 = vadd.f32 %v442_v50, %v439_v46  ;;  %v446_v57 = vmul.f32 %v445_v52, %v970_v29  ;;  %s1058_s28 = sld [smem:[#allocation6 + $0x6]] }
  0x6a   : > { %676 = vst [vmem:[%s1002_s15 + $0x6] sm:$0x3] %v408_v54  ;;  %v450_v58 = vmul.f32 %v449_v53, %v977_v34  ;;  %s1062_s29 = sld [smem:[#allocation6 + $0x86]]  ;;  %v453_v62 = vstv %s1041_s21  ;;  %v456_v4 = vstv %s1045_s23 }
  0x6b   : > { %v431_v59 = vadd.f32 %v430_v51, %v428_v55  ;;  %v447_v60 = vadd.f32 %v446_v57, %v443_v56  ;;  %v464_v61 = vstv %s691_s22  ;;  %s698_s30 = sld [smem:[#allocation4 + $0x380]] }
  0x6c   : > { %v465_v63 = vmul.f32 %v464_v61, %v960_v16  ;;  %v467_v0 = vstv %s692_s25  ;;  %s699_s5 = sld [smem:[#allocation4 + $0x381]] }
  0x6d   : > { %vm432_vm8 = vcmp.ge.f32.partialorder %v431_v59, 0.0  ;;  %v433_v1 = vmul.f32 0.1, %v431_v59  ;;  %v451_v2 = vadd.f32 %v450_v58, %v447_v60  ;;  %v468_v3 = vmul.f32 %v467_v0, %v966_v22  ;;  %s700_s6 = sld [smem:[#allocation4 + $0x382]] }
  0x6e   : > { %v471_v5 = vstv %s1050_s26  ;;  %v475_v6 = vstv %s1055_s27  ;;  %s701_s7 = sld [smem:[#allocation4 + $0x383]] }
  0x6f   : > { %v434_v7 = vsel %vm432_vm8, %v431_v59, %v433_v1  ;;  %v454_v8 = vmul.f32 %v453_v62, %v451_v2  ;;  %v469_v9 = vadd.f32 %v468_v3, %v465_v63  ;;  %v472_v10 = vmul.f32 %v471_v5, %v970_v29  ;;  %s702_s8 = sld [smem:[#allocation6 + $0x7]] }
  0x70   : > { %683 = vst [vmem:[%s1002_s15 + $0x8] sm:$0x3] %v434_v7  ;;  %v476_v11 = vmul.f32 %v475_v6, %v977_v34  ;;  %v479_v15 = vstv %s1058_s28  ;;  %s703_s9 = sld [smem:[#allocation6 + $0x87]]  ;;  %v482_v23 = vstv %s1062_s29 }
  0x71   : > { %v457_v12 = vadd.f32 %v456_v4, %v454_v8  ;;  %v473_v13 = vadd.f32 %v472_v10, %v469_v9  ;;  %v490_v14 = vstv %s698_s30 }
  0x72   : > { %v491_v17 = vmul.f32 %v490_v14, %v960_v16  ;;  %v493_v18 = vstv %s699_s5 }
  0x73   : > { %vm458_vm9 = vcmp.ge.f32.partialorder %v457_v12, 0.0  ;;  %v459_v19 = vmul.f32 0.1, %v457_v12  ;;  %v477_v20 = vadd.f32 %v476_v11, %v473_v13  ;;  %v494_v21 = vmul.f32 %v493_v18, %v966_v22 }
  0x74   : > { %v497_v24 = vstv %s700_s6  ;;  %v501_v25 = vstv %s701_s7 }
  0x75   : > { %v460_v26 = vsel %vm458_vm9, %v457_v12, %v459_v19  ;;  %v480_v27 = vmul.f32 %v479_v15, %v477_v20  ;;  %v495_v28 = vadd.f32 %v494_v21, %v491_v17  ;;  %v498_v30 = vmul.f32 %v497_v24, %v970_v29 }
  0x76   : > { %690 = vst [vmem:[%s1002_s15 + $0xa] sm:$0x3] %v460_v26  ;;  %v502_v16 = vmul.f32 %v501_v25, %v977_v34  ;;  %v505_v33 = vstv %s702_s8  ;;  %v508_v22 = vstv %s703_s9 }
  0x77   : > { %v483_v31 = vadd.f32 %v482_v23, %v480_v27  ;;  %v499_v32 = vadd.f32 %v498_v30, %v495_v28 }
  0x79   : > { %vm484_vm10 = vcmp.ge.f32.partialorder %v483_v31, 0.0  ;;  %v485_v35 = vmul.f32 0.1, %v483_v31  ;;  %v503_v36 = vadd.f32 %v502_v16, %v499_v32 }
  0x7b   : > { %v486_v37 = vsel %vm484_vm10, %v483_v31, %v485_v35  ;;  %v506_v38 = vmul.f32 %v505_v33, %v503_v36 }
  0x7c   : > { %697 = vst [vmem:[%s1002_s15 + $0xc] sm:$0x3] %v486_v37 }
  0x7d   : > { %v509_v39 = vadd.f32 %v508_v22, %v506_v38 }
  0x7f   : > { %vm510_vm11 = vcmp.ge.f32.partialorder %v509_v39, 0.0  ;;  %v511_v40 = vmul.f32 0.1, %v509_v39 }
  0x81   : > { %v512_v41 = vsel %vm510_vm11, %v509_v39, %v511_v40 }
  0x82   : > { %704 = vst [vmem:[%s1002_s15 + $0xe] sm:$0x3] %v512_v41 }
  0x83 PF: > { %s16_s17 = sadd.s32 1, %s839_s17   ;;  %s1105_s15 = smov %s835_s16 }
  0x84   : > { %p13_p5 = scmp.ge.s32.totalorder %s16_s17, 4   ;;  %s1106_s16 = smov %s1108_s24 }
  0x86   :  { %15 = sbr.rel (!%p13_p5) target bundleno = 3 (0x3), region = 86 }
  0x8b   :  { %542 = vsyncpa [#allocation3], 1 }
  0x8c   :  { %544 = vsyncpa [#allocation3 + $0x1], 1 }
  0x8d   :  { %545 = vsyncpa [#allocation5], 1 }

</bundles_post_ra>
